<compile_context>
chip_gen: v5e
topology: v5e:2x2
jax: 0.10.0
libtpu: 0.0.40
codegen_flags: <defaults>
</compile_context>

<pallas_src>
import jax
import jax.numpy as jnp
from jax.experimental import pallas as pl
from jax.experimental.pallas import tpu as pltpu

CP = 128                       # lane-padded output-channel width of conv stages
_VMEM_LIMIT = 32 << 20         # explicit scoped-VMEM budget (fits every gen)


def _round_up(x, m):
    return (x + m - 1) // m * m


def _pad2(a, rows, cols):
    return jnp.pad(a, ((0, rows - a.shape[0]), (0, cols - a.shape[1])))


def _block_diag(blocks):
    """Tiny one-time block-diagonal builder (prep only, not in the forward)."""
    rows = sum(b.shape[0] for b in blocks)
    cols = sum(b.shape[1] for b in blocks)
    out = jnp.zeros((rows, cols), blocks[0].dtype)
    r = c = 0
    for b in blocks:
        out = out.at[r:r + b.shape[0], c:c + b.shape[1]].set(b)
        r += b.shape[0]
        c += b.shape[1]
    return out


# ----------------------------------------------------------------------------
# Conv + ReLU + MaxPool kernel
# ----------------------------------------------------------------------------
def _conv_pool_kernel(p_ref, w_ref, b_ref, o_ref):
    # p_ref: (4, TR, KP) bf16 -- 4 = 2x2 pool offsets, TR = tile of pooled
    #        positions (batch folded in), KP = lane-padded 9*Cin.
    # w_ref: (KP, 128) bf16; b_ref: (1, 128) f32; o_ref: (TR, 128) bf16.
    tr = p_ref.shape[1]
    kp = p_ref.shape[2]
    p = p_ref[...].reshape(4 * tr, kp)            # fold pool offsets into M
    m = jnp.dot(p, w_ref[...], preferred_element_type=jnp.float32)
    m = jnp.max(m.reshape(4, tr, m.shape[-1]), axis=0)    # 2x2 max pool (VPU)
    # max-pool commutes with the shared per-channel bias add and monotone ReLU
    o_ref[...] = jnp.maximum(m + b_ref[...], 0.0).astype(o_ref.dtype)


def conv_relu_pool(x, w2d, b2d, cout):
    """x: (B, H, W, Cin) bf16 NHWC with the REAL (unpadded) channel count.
    w2d: (KP, 128) bf16 (9*Cin real rows); b2d: (1, 128) f32.
    Returns (B, H//2, W//2, cout) bf16 (real channels only)."""
    B, H, W, C = x.shape
    assert H % 2 == 0 and W % 2 == 0, "spatial dims must be even at every stage"
    Hh, Wh = H // 2, W // 2
    R = B * Hh * Wh
    KP = w2d.shape[0]
    K9 = 9 * C

    # --- im2col (pure XLA layout glue; K is only the real 9*Cin, no lane pad) ---
    xp = jnp.pad(x, ((0, 0), (1, 1), (1, 1), (0, 0)))
    taps = [xp[:, dy:dy + H, dx:dx + W, :]
            for dy in range(3) for dx in range(3)]
    full = jnp.concatenate(taps, axis=-1)                      # (B, H, W, 9C)
    full = full.reshape(B, Hh, 2, Wh, 2, K9)
    patches = jnp.transpose(full, (2, 4, 0, 1, 3, 5)).reshape(4, R, K9)

    # --- pick the row tile FIRST, then pad rows up to a multiple of it ---
    R16 = _round_up(R, 16)                 # bf16 sublane alignment
    TR = 512
    if R16 < 2 * TR:                       # expose >= 2 grid steps (megacore)
        TR = max(16, _round_up((R16 + 1) // 2, 16))
    Rp = _round_up(R16, TR)

    patches = jnp.pad(patches, ((0, 0), (0, Rp - R), (0, KP - K9)))

    out = pl.pallas_call(
        _conv_pool_kernel,
        grid=(Rp // TR,),
        in_specs=[
            pl.BlockSpec((4, TR, KP), lambda i: (0, i, 0)),
            pl.BlockSpec((KP, 128), lambda i: (0, 0)),
            pl.BlockSpec((1, 128), lambda i: (0, 0)),
        ],
        out_specs=pl.BlockSpec((TR, 128), lambda i: (i, 0)),
        out_shape=jax.ShapeDtypeStruct((Rp, 128), jnp.bfloat16),
        compiler_params=pltpu.CompilerParams(
            dimension_semantics=("parallel",),
            vmem_limit_bytes=_VMEM_LIMIT),
    )(patches, w2d, b2d)
    return out[:R, :cout].reshape(B, Hh, Wh, cout)


# ----------------------------------------------------------------------------
# Fused dense kernel: fc1 + input branches + fusion MLP + output heads
# (all per-marker / per-head structure folded into block-diagonal weights,
#  every K / N of the 7 chained matmuls padded to a multiple of 128)
# ----------------------------------------------------------------------------
def _fused_dense_kernel(feat_ref, ann_ref,
                        fc1_w_ref, fc1_b_ref,
                        br1_w_ref, br1_b_ref, br2_w_ref, br2_b_ref,
                        w1v_ref, w1b_ref, fus_b1_ref, fus_w2_ref, fus_b2_ref,
                        hw1_ref, hb1_ref, hw2_ref, hb2_ref,
                        out_ref):
    f32, bf16 = jnp.float32, jnp.bfloat16

    # video features: ReLU(fc1(feat))   (dropout = identity at inference)
    vf = jnp.maximum(
        jnp.dot(feat_ref[...], fc1_w_ref[...], preferred_element_type=f32)
        + fc1_b_ref[...], 0.0)

    # all input branches at once via block-diagonal weights
    h1 = jnp.maximum(
        jnp.dot(ann_ref[...], br1_w_ref[...], preferred_element_type=f32)
        + br1_b_ref[...], 0.0)
    h2 = jnp.maximum(
        jnp.dot(h1.astype(bf16), br2_w_ref[...], preferred_element_type=f32)
        + br2_b_ref[...], 0.0)

    # fusion MLP (first linear split into video / branch column blocks)
    f1 = jnp.maximum(
        jnp.dot(vf.astype(bf16), w1v_ref[...], preferred_element_type=f32)
        + jnp.dot(h2.astype(bf16), w1b_ref[...], preferred_element_type=f32)
        + fus_b1_ref[...], 0.0)
    f2 = jnp.maximum(
        jnp.dot(f1.astype(bf16), fus_w2_ref[...], preferred_element_type=f32)
        + fus_b2_ref[...], 0.0)

    # output heads: first layers concatenated, second layers block-diagonal
    g = jnp.maximum(
        jnp.dot(f2.astype(bf16), hw1_ref[...], preferred_element_type=f32)
        + hb1_ref[...], 0.0)
    out_ref[...] = (
        jnp.dot(g.astype(bf16), hw2_ref[...], preferred_element_type=f32)
        + hb2_ref[...])


def fused_dense(feat, ann, prep, num_heads):
    B, Kfc = feat.shape
    AP = ann.shape[1]
    OP = prep["hb2"].shape[1]

    B16 = _round_up(B, 16)
    TB = 128
    if B16 < 2 * TB:                      # expose >= 2 grid steps when possible
        TB = max(16, _round_up((B16 + 1) // 2, 16))
    BP = _round_up(B16, TB)

    featp = jnp.pad(feat, ((0, BP - B), (0, 0)))
    annp = jnp.pad(ann, ((0, BP - B), (0, 0)))

    w_names = ("fc1_w", "fc1_b", "br1_w", "br1_b", "br2_w", "br2_b",
               "w1v", "w1b", "fus_b1", "fus_w2", "fus_b2",
               "hw1", "hb1", "hw2", "hb2")
    weights = [prep[n] for n in w_names]
    w_specs = [pl.BlockSpec(w.shape, lambda i: (0, 0)) for w in weights]

    out = pl.pallas_call(
        _fused_dense_kernel,
        grid=(BP // TB,),
        in_specs=[pl.BlockSpec((TB, Kfc), lambda i: (i, 0)),
                  pl.BlockSpec((TB, AP), lambda i: (i, 0))] + w_specs,
        out_specs=pl.BlockSpec((TB, OP), lambda i: (i, 0)),
        out_shape=jax.ShapeDtypeStruct((BP, OP), jnp.float32),
        compiler_params=pltpu.CompilerParams(
            dimension_semantics=("parallel",),
            vmem_limit_bytes=_VMEM_LIMIT),
    )(featp, annp, *weights)
    return out[:B, :num_heads]


# ----------------------------------------------------------------------------
# Parameter init (deterministic, PyTorch parameter layouts)
# ----------------------------------------------------------------------------
def init_params(key, img_size, num_markers, num_heads):
    keys = iter(jax.random.split(key, 24))

    def nrm(shape, scale=0.1):
        return scale * jax.random.normal(next(keys), shape, jnp.float32)

    conv_out = (img_size // 8) ** 2 * 48
    M, K = num_markers, num_heads
    return {
        "conv1_w": nrm((12, 3, 3, 3)),   "conv1_b": nrm((12,)),
        "conv2_w": nrm((24, 12, 3, 3)),  "conv2_b": nrm((24,)),
        "conv3_w": nrm((48, 24, 3, 3)),  "conv3_b": nrm((48,)),
        "fc1_w":   nrm((128, conv_out)), "fc1_b":   nrm((128,)),
        "br_w1":   nrm((M, 16, 1)),      "br_b1":   nrm((M, 16)),
        "br_w2":   nrm((M, 24, 16)),     "br_b2":   nrm((M, 24)),
        "fus_w1":  nrm((128, 128 + 24 * M)), "fus_b1": nrm((128,)),
        "fus_w2":  nrm((64, 128)),        "fus_b2": nrm((64,)),
        "head_w1": nrm((K, 32, 64)),     "head_b1": nrm((K, 32)),
        "head_w2": nrm((K, 1, 32)),      "head_b2": nrm((K, 1)),
    }


# ----------------------------------------------------------------------------
# One-time parameter preparation (ALL repacking hoisted out of the forward)
# ----------------------------------------------------------------------------
def prepare_params(params, img_size, num_markers, num_heads):
    assert img_size % 8 == 0, "img_size must be divisible by 8 (3 pool stages)"
    M, K = num_markers, num_heads
    bf16, f32 = jnp.bfloat16, jnp.float32

    def conv_pack(w_pt, b):
        # Pack conv weights against the REAL Cin: rows = 9*Cin padded to a
        # 128 multiple (no per-channel lane-pad inflation), cols = Cout -> 128.
        cout, cin = w_pt.shape[0], w_pt.shape[1]
        w = jnp.transpose(w_pt, (2, 3, 1, 0))                 # (3,3,Cin,Cout)
        w2d = w.reshape(9 * cin, cout)
        kp = _round_up(9 * cin, 128)
        w2d = _pad2(w2d, kp, CP)
        b2d = jnp.pad(b, (0, CP - cout)).reshape(1, CP)
        return w2d.astype(bf16), b2d.astype(f32)

    c1_w, c1_b = conv_pack(params["conv1_w"], params["conv1_b"])
    c2_w, c2_b = conv_pack(params["conv2_w"], params["conv2_b"])
    c3_w, c3_b = conv_pack(params["conv3_w"], params["conv3_b"])

    # fc1: fold the PyTorch NCHW-order flatten into a row permutation of the
    # weight, built against the real 48-channel NHWC flatten (no lane pad);
    # only the final flattened K is padded to a multiple of 128.
    S8 = img_size // 8
    n_flat = S8 * S8 * 48
    Kfc = _round_up(n_flat, 128)
    fc1 = params["fc1_w"].reshape(128, 48, S8, S8)            # (out, c, h, w)
    fc1 = jnp.transpose(fc1, (2, 3, 1, 0)).reshape(n_flat, 128)   # (h,w,c)->
    fc1_w = _pad2(fc1, Kfc, 128).astype(bf16)
    fc1_b = params["fc1_b"].reshape(1, 128).astype(f32)

    # lane-aligned widths for the dense chain (zero pads stay zero through it)
    AP = _round_up(M, 128)
    B1 = _round_up(16 * M, 128)
    B2 = _round_up(24 * M, 128)
    F2P = _round_up(64, 128)
    H1 = _round_up(32 * K, 128)
    OP = _round_up(K, 128)

    # input branches as block-diagonal weights
    br1_w = _pad2(_block_diag([params["br_w1"][m].T for m in range(M)]), AP, B1)
    br1_b = _pad2(params["br_b1"].reshape(1, 16 * M), 1, B1)
    br2_w = _pad2(_block_diag([params["br_w2"][m].T for m in range(M)]), B1, B2)
    br2_b = _pad2(params["br_b2"].reshape(1, 24 * M), 1, B2)

    # fusion layer (first linear split into video / branch column blocks)
    fus_w1t = params["fus_w1"].T                              # (128+24M, 128)
    w1v = fus_w1t[:128]
    w1b = _pad2(fus_w1t[128:], B2, 128)
    fus_b1 = params["fus_b1"].reshape(1, 128)
    fus_w2 = _pad2(params["fus_w2"].T, 128, F2P)
    fus_b2 = _pad2(params["fus_b2"].reshape(1, 64), 1, F2P)

    # output heads (first layers concatenated, second layers block-diagonal)
    hw1 = _pad2(jnp.transpose(params["head_w1"], (2, 0, 1)).reshape(64, 32 * K),
                F2P, H1)
    hb1 = _pad2(params["head_b1"].reshape(1, 32 * K), 1, H1)
    hw2 = _pad2(_block_diag([params["head_w2"][k].T for k in range(K)]), H1, OP)
    hb2 = _pad2(params["head_b2"].reshape(1, K), 1, OP)

    return {
        "c1_w": c1_w, "c1_b": c1_b, "c2_w": c2_w, "c2_b": c2_b,
        "c3_w": c3_w, "c3_b": c3_b,
        "fc1_w": fc1_w, "fc1_b": fc1_b,
        "br1_w": br1_w.astype(bf16), "br1_b": br1_b.astype(f32),
        "br2_w": br2_w.astype(bf16), "br2_b": br2_b.astype(f32),
        "w1v": w1v.astype(bf16), "w1b": w1b.astype(bf16),
        "fus_b1": fus_b1.astype(f32),
        "fus_w2": fus_w2.astype(bf16), "fus_b2": fus_b2.astype(f32),
        "hw1": hw1.astype(bf16), "hb1": hb1.astype(f32),
        "hw2": hw2.astype(bf16), "hb2": hb2.astype(f32),
    }


# ----------------------------------------------------------------------------
# Full forward pass
# ----------------------------------------------------------------------------
def multimodal_forward(video_nchw, annotations, prep, num_heads):
    # --- video backbone: 3 conv+relu+pool Pallas kernels, bf16 activations ---
    x = jnp.transpose(video_nchw, (0, 2, 3, 1)).astype(jnp.bfloat16)   # NHWC
    x = conv_relu_pool(x, prep["c1_w"], prep["c1_b"], 12)
    x = conv_relu_pool(x, prep["c2_w"], prep["c2_b"], 24)
    x = conv_relu_pool(x, prep["c3_w"], prep["c3_b"], 48)
    B = x.shape[0]

    # NHWC flatten of the real 48 channels; the NCHW->NHWC reorder is folded
    # into fc1_w, only the flattened K is padded to a 128 multiple.
    feat = x.reshape(B, -1)
    Kfc = prep["fc1_w"].shape[0]
    feat = jnp.pad(feat, ((0, 0), (0, Kfc - feat.shape[1])))

    AP = prep["br1_w"].shape[0]
    ann = annotations.astype(jnp.bfloat16)
    ann = jnp.pad(ann, ((0, 0), (0, AP - ann.shape[1])))

    return fused_dense(feat, ann, prep, num_heads)


if __name__ == "__main__":
    BATCH, IMG_SIZE, N_IN_MARKERS, N_OUT_MARKERS = 2, 16, 3, 2

    key = jax.random.PRNGKey(0)
    pkey, vkey, akey = jax.random.split(key, 3)
    params = init_params(pkey, IMG_SIZE, N_IN_MARKERS, N_OUT_MARKERS)
    prep = prepare_params(params, IMG_SIZE, N_IN_MARKERS, N_OUT_MARKERS)

    video = jax.random.normal(vkey, (BATCH, 3, IMG_SIZE, IMG_SIZE), jnp.float32)
    annotations = jax.random.normal(akey, (BATCH, N_IN_MARKERS), jnp.float32)

    fwd = jax.jit(multimodal_forward, static_argnames=("num_heads",))
    out = jax.block_until_ready(
        fwd(video, annotations, prep, num_heads=N_OUT_MARKERS))
    assert out.shape == (BATCH, N_OUT_MARKERS)
    assert bool(jnp.all(jnp.isfinite(out)))
    print("KERNEL_OK")
</pallas_src>

<mosaic_0001>
module attributes {stable_mosaic.version = 11 : i64} {
  func.func @_conv_pool_kernel(%arg0: i32, %arg1: memref<4x64x128xbf16, #tpu.memory_space<vmem>>, %arg2: memref<128x128xbf16, #tpu.memory_space<vmem>>, %arg3: memref<1x128xf32, #tpu.memory_space<vmem>>, %arg4: memref<64x128xbf16, #tpu.memory_space<vmem>>) attributes {dimension_semantics = [#tpu.dimension_semantics<parallel>], iteration_bounds = array<i64: 2>, scalar_prefetch = 0 : i64, scratch_operands = 0 : i64, tpu.core_type = #tpu.core_type<tc>, window_params = [{transform_indices = @transform_0, window_bounds = array<i64: 4, 64, 128>}, {pipeline_mode = #tpu.pipeline_mode<synchronous>, transform_indices = @transform_1, window_bounds = array<i64: 128, 128>}, {pipeline_mode = #tpu.pipeline_mode<synchronous>, transform_indices = @transform_2, window_bounds = array<i64: 1, 128>}, {transform_indices = @transform_3, window_bounds = array<i64: 64, 128>}]} {
    %c0 = arith.constant 0 : index
    %c0_0 = arith.constant 0 : index
    %c0_1 = arith.constant 0 : index
    %0 = vector.load %arg1[%c0, %c0_0, %c0_1] : memref<4x64x128xbf16, #tpu.memory_space<vmem>>, vector<4x64x128xbf16>
    %1 = vector.shape_cast %0 : vector<4x64x128xbf16> to vector<256x128xbf16>
    %c0_2 = arith.constant 0 : index
    %c0_3 = arith.constant 0 : index
    %2 = vector.load %arg2[%c0_2, %c0_3] : memref<128x128xbf16, #tpu.memory_space<vmem>>, vector<128x128xbf16>
    %cst = arith.constant dense<0.000000e+00> : vector<256x128xf32>
    %3 = tpu.matmul %1, %2, %cst {dimension_numbers = #tpu.dot_dimension_numbers<[1], [0], [0], [1], [0, 0, 1, 1], [], []>} : vector<256x128xbf16>, vector<128x128xbf16>, vector<256x128xf32> -> vector<256x128xf32>
    %4 = vector.shape_cast %3 : vector<256x128xf32> to vector<4x64x128xf32>
    %cst_4 = arith.constant dense<0xFF800000> : vector<64x128xf32>
    %5 = vector.multi_reduction <maximumf>, %4, %cst_4 [0] : vector<4x64x128xf32> to vector<64x128xf32>
    %c0_5 = arith.constant 0 : index
    %c0_6 = arith.constant 0 : index
    %6 = vector.load %arg3[%c0_5, %c0_6] : memref<1x128xf32, #tpu.memory_space<vmem>>, vector<1x128xf32>
    %7 = vector.broadcast %6 : vector<1x128xf32> to vector<64x128xf32>
    %8 = arith.addf %5, %7 : vector<64x128xf32>
    %cst_7 = arith.constant 0.000000e+00 : f32
    %9 = vector.broadcast %cst_7 : f32 to vector<64x128xf32>
    %10 = arith.maximumf %8, %9 : vector<64x128xf32>
    %11 = arith.truncf %10 : vector<64x128xf32> to vector<64x128xbf16>
    %c0_8 = arith.constant 0 : index
    %c0_9 = arith.constant 0 : index
    %12 = vector.load %arg4[%c0_8, %c0_9] : memref<64x128xbf16, #tpu.memory_space<vmem>>, vector<64x128xbf16>
    tpu.vector_store %arg4[%c0_8, %c0_9], %11 {strides = array<i32>} : memref<64x128xbf16, #tpu.memory_space<vmem>>, vector<64x128xbf16>,
    return
  }
  func.func @transform_0(%arg0: i32) -> (i32, i32, i32) {
    %c0_i32 = arith.constant 0 : i32
    %c0_i32_0 = arith.constant 0 : i32
    %c0_i32_1 = arith.constant 0 : i32
    return %c0_i32, %arg0, %c0_i32_0 : i32, i32, i32
  }
  func.func @transform_1(%arg0: i32) -> (i32, i32) {
    %c0_i32 = arith.constant 0 : i32
    %c0_i32_0 = arith.constant 0 : i32
    %c0_i32_1 = arith.constant 0 : i32
    return %c0_i32, %c0_i32_0 : i32, i32
  }
  func.func @transform_2(%arg0: i32) -> (i32, i32) {
    %c0_i32 = arith.constant 0 : i32
    %c0_i32_0 = arith.constant 0 : i32
    %c0_i32_1 = arith.constant 0 : i32
    return %c0_i32, %c0_i32_0 : i32, i32
  }
  func.func @transform_3(%arg0: i32) -> (i32, i32) {
    %c0_i32 = arith.constant 0 : i32
    %c0_i32_0 = arith.constant 0 : i32
    return %arg0, %c0_i32 : i32, i32
  }
}

module attributes {stable_mosaic.version = 11 : i64} {
  func.func @_conv_pool_kernel(%arg0: i32, %arg1: memref<4x16x128xbf16, #tpu.memory_space<vmem>>, %arg2: memref<128x128xbf16, #tpu.memory_space<vmem>>, %arg3: memref<1x128xf32, #tpu.memory_space<vmem>>, %arg4: memref<16x128xbf16, #tpu.memory_space<vmem>>) attributes {dimension_semantics = [#tpu.dimension_semantics<parallel>], iteration_bounds = array<i64: 2>, scalar_prefetch = 0 : i64, scratch_operands = 0 : i64, tpu.core_type = #tpu.core_type<tc>, window_params = [{transform_indices = @transform_0, window_bounds = array<i64: 4, 16, 128>}, {pipeline_mode = #tpu.pipeline_mode<synchronous>, transform_indices = @transform_1, window_bounds = array<i64: 128, 128>}, {pipeline_mode = #tpu.pipeline_mode<synchronous>, transform_indices = @transform_2, window_bounds = array<i64: 1, 128>}, {transform_indices = @transform_3, window_bounds = array<i64: 16, 128>}]} {
    %c0 = arith.constant 0 : index
    %c0_0 = arith.constant 0 : index
    %c0_1 = arith.constant 0 : index
    %0 = vector.load %arg1[%c0, %c0_0, %c0_1] : memref<4x16x128xbf16, #tpu.memory_space<vmem>>, vector<4x16x128xbf16>
    %1 = vector.shape_cast %0 : vector<4x16x128xbf16> to vector<64x128xbf16>
    %c0_2 = arith.constant 0 : index
    %c0_3 = arith.constant 0 : index
    %2 = vector.load %arg2[%c0_2, %c0_3] : memref<128x128xbf16, #tpu.memory_space<vmem>>, vector<128x128xbf16>
    %cst = arith.constant dense<0.000000e+00> : vector<64x128xf32>
    %3 = tpu.matmul %1, %2, %cst {dimension_numbers = #tpu.dot_dimension_numbers<[1], [0], [0], [1], [0, 0, 1, 1], [], []>} : vector<64x128xbf16>, vector<128x128xbf16>, vector<64x128xf32> -> vector<64x128xf32>
    %4 = vector.shape_cast %3 : vector<64x128xf32> to vector<4x16x128xf32>
    %cst_4 = arith.constant dense<0xFF800000> : vector<16x128xf32>
    %5 = vector.multi_reduction <maximumf>, %4, %cst_4 [0] : vector<4x16x128xf32> to vector<16x128xf32>
    %c0_5 = arith.constant 0 : index
    %c0_6 = arith.constant 0 : index
    %6 = vector.load %arg3[%c0_5, %c0_6] : memref<1x128xf32, #tpu.memory_space<vmem>>, vector<1x128xf32>
    %7 = vector.broadcast %6 : vector<1x128xf32> to vector<16x128xf32>
    %8 = arith.addf %5, %7 : vector<16x128xf32>
    %cst_7 = arith.constant 0.000000e+00 : f32
    %9 = vector.broadcast %cst_7 : f32 to vector<16x128xf32>
    %10 = arith.maximumf %8, %9 : vector<16x128xf32>
    %11 = arith.truncf %10 : vector<16x128xf32> to vector<16x128xbf16>
    %c0_8 = arith.constant 0 : index
    %c0_9 = arith.constant 0 : index
    %12 = vector.load %arg4[%c0_8, %c0_9] : memref<16x128xbf16, #tpu.memory_space<vmem>>, vector<16x128xbf16>
    tpu.vector_store %arg4[%c0_8, %c0_9], %11 {strides = array<i32>} : memref<16x128xbf16, #tpu.memory_space<vmem>>, vector<16x128xbf16>,
    return
  }
  func.func @transform_0(%arg0: i32) -> (i32, i32, i32) {
    %c0_i32 = arith.constant 0 : i32
    %c0_i32_0 = arith.constant 0 : i32
    %c0_i32_1 = arith.constant 0 : i32
    return %c0_i32, %arg0, %c0_i32_0 : i32, i32, i32
  }
  func.func @transform_1(%arg0: i32) -> (i32, i32) {
    %c0_i32 = arith.constant 0 : i32
    %c0_i32_0 = arith.constant 0 : i32
    %c0_i32_1 = arith.constant 0 : i32
    return %c0_i32, %c0_i32_0 : i32, i32
  }
  func.func @transform_2(%arg0: i32) -> (i32, i32) {
    %c0_i32 = arith.constant 0 : i32
    %c0_i32_0 = arith.constant 0 : i32
    %c0_i32_1 = arith.constant 0 : i32
    return %c0_i32, %c0_i32_0 : i32, i32
  }
  func.func @transform_3(%arg0: i32) -> (i32, i32) {
    %c0_i32 = arith.constant 0 : i32
    %c0_i32_0 = arith.constant 0 : i32
    return %arg0, %c0_i32 : i32, i32
  }
}

module attributes {stable_mosaic.version = 11 : i64} {
  func.func @_conv_pool_kernel(%arg0: i32, %arg1: memref<4x16x256xbf16, #tpu.memory_space<vmem>>, %arg2: memref<256x128xbf16, #tpu.memory_space<vmem>>, %arg3: memref<1x128xf32, #tpu.memory_space<vmem>>, %arg4: memref<16x128xbf16, #tpu.memory_space<vmem>>) attributes {dimension_semantics = [#tpu.dimension_semantics<parallel>], iteration_bounds = array<i64: 1>, scalar_prefetch = 0 : i64, scratch_operands = 0 : i64, tpu.core_type = #tpu.core_type<tc>, window_params = [{transform_indices = @transform_0, window_bounds = array<i64: 4, 16, 256>}, {pipeline_mode = #tpu.pipeline_mode<synchronous>, transform_indices = @transform_1, window_bounds = array<i64: 256, 128>}, {pipeline_mode = #tpu.pipeline_mode<synchronous>, transform_indices = @transform_2, window_bounds = array<i64: 1, 128>}, {transform_indices = @transform_3, window_bounds = array<i64: 16, 128>}]} {
    %c0 = arith.constant 0 : index
    %c0_0 = arith.constant 0 : index
    %c0_1 = arith.constant 0 : index
    %0 = vector.load %arg1[%c0, %c0_0, %c0_1] : memref<4x16x256xbf16, #tpu.memory_space<vmem>>, vector<4x16x256xbf16>
    %1 = vector.shape_cast %0 : vector<4x16x256xbf16> to vector<64x256xbf16>
    %c0_2 = arith.constant 0 : index
    %c0_3 = arith.constant 0 : index
    %2 = vector.load %arg2[%c0_2, %c0_3] : memref<256x128xbf16, #tpu.memory_space<vmem>>, vector<256x128xbf16>
    %cst = arith.constant dense<0.000000e+00> : vector<64x128xf32>
    %3 = tpu.matmul %1, %2, %cst {dimension_numbers = #tpu.dot_dimension_numbers<[1], [0], [0], [1], [0, 0, 1, 1], [], []>} : vector<64x256xbf16>, vector<256x128xbf16>, vector<64x128xf32> -> vector<64x128xf32>
    %4 = vector.shape_cast %3 : vector<64x128xf32> to vector<4x16x128xf32>
    %cst_4 = arith.constant dense<0xFF800000> : vector<16x128xf32>
    %5 = vector.multi_reduction <maximumf>, %4, %cst_4 [0] : vector<4x16x128xf32> to vector<16x128xf32>
    %c0_5 = arith.constant 0 : index
    %c0_6 = arith.constant 0 : index
    %6 = vector.load %arg3[%c0_5, %c0_6] : memref<1x128xf32, #tpu.memory_space<vmem>>, vector<1x128xf32>
    %7 = vector.broadcast %6 : vector<1x128xf32> to vector<16x128xf32>
    %8 = arith.addf %5, %7 : vector<16x128xf32>
    %cst_7 = arith.constant 0.000000e+00 : f32
    %9 = vector.broadcast %cst_7 : f32 to vector<16x128xf32>
    %10 = arith.maximumf %8, %9 : vector<16x128xf32>
    %11 = arith.truncf %10 : vector<16x128xf32> to vector<16x128xbf16>
    %c0_8 = arith.constant 0 : index
    %c0_9 = arith.constant 0 : index
    %12 = vector.load %arg4[%c0_8, %c0_9] : memref<16x128xbf16, #tpu.memory_space<vmem>>, vector<16x128xbf16>
    tpu.vector_store %arg4[%c0_8, %c0_9], %11 {strides = array<i32>} : memref<16x128xbf16, #tpu.memory_space<vmem>>, vector<16x128xbf16>,
    return
  }
  func.func @transform_0(%arg0: i32) -> (i32, i32, i32) {
    %c0_i32 = arith.constant 0 : i32
    %c0_i32_0 = arith.constant 0 : i32
    %c0_i32_1 = arith.constant 0 : i32
    return %c0_i32, %arg0, %c0_i32_0 : i32, i32, i32
  }
  func.func @transform_1(%arg0: i32) -> (i32, i32) {
    %c0_i32 = arith.constant 0 : i32
    %c0_i32_0 = arith.constant 0 : i32
    %c0_i32_1 = arith.constant 0 : i32
    return %c0_i32, %c0_i32_0 : i32, i32
  }
  func.func @transform_2(%arg0: i32) -> (i32, i32) {
    %c0_i32 = arith.constant 0 : i32
    %c0_i32_0 = arith.constant 0 : i32
    %c0_i32_1 = arith.constant 0 : i32
    return %c0_i32, %c0_i32_0 : i32, i32
  }
  func.func @transform_3(%arg0: i32) -> (i32, i32) {
    %c0_i32 = arith.constant 0 : i32
    %c0_i32_0 = arith.constant 0 : i32
    return %arg0, %c0_i32 : i32, i32
  }
}

module attributes {stable_mosaic.version = 11 : i64} {
  func.func @_fused_dense_kernel(%arg0: i32, %arg1: memref<16x256xbf16, #tpu.memory_space<vmem>>, %arg2: memref<16x128xbf16, #tpu.memory_space<vmem>>, %arg3: memref<256x128xbf16, #tpu.memory_space<vmem>>, %arg4: memref<1x128xf32, #tpu.memory_space<vmem>>, %arg5: memref<128x128xbf16, #tpu.memory_space<vmem>>, %arg6: memref<1x128xf32, #tpu.memory_space<vmem>>, %arg7: memref<128x128xbf16, #tpu.memory_space<vmem>>, %arg8: memref<1x128xf32, #tpu.memory_space<vmem>>, %arg9: memref<128x128xbf16, #tpu.memory_space<vmem>>, %arg10: memref<128x128xbf16, #tpu.memory_space<vmem>>, %arg11: memref<1x128xf32, #tpu.memory_space<vmem>>, %arg12: memref<128x128xbf16, #tpu.memory_space<vmem>>, %arg13: memref<1x128xf32, #tpu.memory_space<vmem>>, %arg14: memref<128x128xbf16, #tpu.memory_space<vmem>>, %arg15: memref<1x128xf32, #tpu.memory_space<vmem>>, %arg16: memref<128x128xbf16, #tpu.memory_space<vmem>>, %arg17: memref<1x128xf32, #tpu.memory_space<vmem>>, %arg18: memref<16x128xf32, #tpu.memory_space<vmem>>) attributes {dimension_semantics = [#tpu.dimension_semantics<parallel>], iteration_bounds = array<i64: 1>, scalar_prefetch = 0 : i64, scratch_operands = 0 : i64, tpu.core_type = #tpu.core_type<tc>, window_params = [{transform_indices = @transform_0, window_bounds = array<i64: 16, 256>}, {transform_indices = @transform_1, window_bounds = array<i64: 16, 128>}, {pipeline_mode = #tpu.pipeline_mode<synchronous>, transform_indices = @transform_2, window_bounds = array<i64: 256, 128>}, {pipeline_mode = #tpu.pipeline_mode<synchronous>, transform_indices = @transform_3, window_bounds = array<i64: 1, 128>}, {pipeline_mode = #tpu.pipeline_mode<synchronous>, transform_indices = @transform_4, window_bounds = array<i64: 128, 128>}, {pipeline_mode = #tpu.pipeline_mode<synchronous>, transform_indices = @transform_5, window_bounds = array<i64: 1, 128>}, {pipeline_mode = #tpu.pipeline_mode<synchronous>, transform_indices = @transform_6, window_bounds = array<i64: 128, 128>}, {pipeline_mode = #tpu.pipeline_mode<synchronous>, transform_indices = @transform_7, window_bounds = array<i64: 1, 128>}, {pipeline_mode = #tpu.pipeline_mode<synchronous>, transform_indices = @transform_8, window_bounds = array<i64: 128, 128>}, {pipeline_mode = #tpu.pipeline_mode<synchronous>, transform_indices = @transform_9, window_bounds = array<i64: 128, 128>}, {pipeline_mode = #tpu.pipeline_mode<synchronous>, transform_indices = @transform_10, window_bounds = array<i64: 1, 128>}, {pipeline_mode = #tpu.pipeline_mode<synchronous>, transform_indices = @transform_11, window_bounds = array<i64: 128, 128>}, {pipeline_mode = #tpu.pipeline_mode<synchronous>, transform_indices = @transform_12, window_bounds = array<i64: 1, 128>}, {pipeline_mode = #tpu.pipeline_mode<synchronous>, transform_indices = @transform_13, window_bounds = array<i64: 128, 128>}, {pipeline_mode = #tpu.pipeline_mode<synchronous>, transform_indices = @transform_14, window_bounds = array<i64: 1, 128>}, {pipeline_mode = #tpu.pipeline_mode<synchronous>, transform_indices = @transform_15, window_bounds = array<i64: 128, 128>}, {pipeline_mode = #tpu.pipeline_mode<synchronous>, transform_indices = @transform_16, window_bounds = array<i64: 1, 128>}, {transform_indices = @transform_17, window_bounds = array<i64: 16, 128>}]} {
    %c0 = arith.constant 0 : index
    %c0_0 = arith.constant 0 : index
    %0 = vector.load %arg1[%c0, %c0_0] : memref<16x256xbf16, #tpu.memory_space<vmem>>, vector<16x256xbf16>
    %c0_1 = arith.constant 0 : index
    %c0_2 = arith.constant 0 : index
    %1 = vector.load %arg3[%c0_1, %c0_2] : memref<256x128xbf16, #tpu.memory_space<vmem>>, vector<256x128xbf16>
    %cst = arith.constant dense<0.000000e+00> : vector<16x128xf32>
    %2 = tpu.matmul %0, %1, %cst {dimension_numbers = #tpu.dot_dimension_numbers<[1], [0], [0], [1], [0, 0, 1, 1], [], []>} : vector<16x256xbf16>, vector<256x128xbf16>, vector<16x128xf32> -> vector<16x128xf32>
    %c0_3 = arith.constant 0 : index
    %c0_4 = arith.constant 0 : index
    %3 = vector.load %arg4[%c0_3, %c0_4] : memref<1x128xf32, #tpu.memory_space<vmem>>, vector<1x128xf32>
    %4 = vector.broadcast %3 : vector<1x128xf32> to vector<16x128xf32>
    %5 = arith.addf %2, %4 : vector<16x128xf32>
    %cst_5 = arith.constant 0.000000e+00 : f32
    %6 = vector.broadcast %cst_5 : f32 to vector<16x128xf32>
    %7 = arith.maximumf %5, %6 : vector<16x128xf32>
    %c0_6 = arith.constant 0 : index
    %c0_7 = arith.constant 0 : index
    %8 = vector.load %arg2[%c0_6, %c0_7] : memref<16x128xbf16, #tpu.memory_space<vmem>>, vector<16x128xbf16>
    %c0_8 = arith.constant 0 : index
    %c0_9 = arith.constant 0 : index
    %9 = vector.load %arg5[%c0_8, %c0_9] : memref<128x128xbf16, #tpu.memory_space<vmem>>, vector<128x128xbf16>
    %cst_10 = arith.constant dense<0.000000e+00> : vector<16x128xf32>
    %10 = tpu.matmul %8, %9, %cst_10 {dimension_numbers = #tpu.dot_dimension_numbers<[1], [0], [0], [1], [0, 0, 1, 1], [], []>} : vector<16x128xbf16>, vector<128x128xbf16>, vector<16x128xf32> -> vector<16x128xf32>
    %c0_11 = arith.constant 0 : index
    %c0_12 = arith.constant 0 : index
    %11 = vector.load %arg6[%c0_11, %c0_12] : memref<1x128xf32, #tpu.memory_space<vmem>>, vector<1x128xf32>
    %12 = vector.broadcast %11 : vector<1x128xf32> to vector<16x128xf32>
    %13 = arith.addf %10, %12 : vector<16x128xf32>
    %cst_13 = arith.constant 0.000000e+00 : f32
    %14 = vector.broadcast %cst_13 : f32 to vector<16x128xf32>
    %15 = arith.maximumf %13, %14 : vector<16x128xf32>
    %16 = arith.truncf %15 : vector<16x128xf32> to vector<16x128xbf16>
    %c0_14 = arith.constant 0 : index
    %c0_15 = arith.constant 0 : index
    %17 = vector.load %arg7[%c0_14, %c0_15] : memref<128x128xbf16, #tpu.memory_space<vmem>>, vector<128x128xbf16>
    %cst_16 = arith.constant dense<0.000000e+00> : vector<16x128xf32>
    %18 = tpu.matmul %16, %17, %cst_16 {dimension_numbers = #tpu.dot_dimension_numbers<[1], [0], [0], [1], [0, 0, 1, 1], [], []>} : vector<16x128xbf16>, vector<128x128xbf16>, vector<16x128xf32> -> vector<16x128xf32>
    %c0_17 = arith.constant 0 : index
    %c0_18 = arith.constant 0 : index
    %19 = vector.load %arg8[%c0_17, %c0_18] : memref<1x128xf32, #tpu.memory_space<vmem>>, vector<1x128xf32>
    %20 = vector.broadcast %19 : vector<1x128xf32> to vector<16x128xf32>
    %21 = arith.addf %18, %20 : vector<16x128xf32>
    %cst_19 = arith.constant 0.000000e+00 : f32
    %22 = vector.broadcast %cst_19 : f32 to vector<16x128xf32>
    %23 = arith.maximumf %21, %22 : vector<16x128xf32>
    %24 = arith.truncf %7 : vector<16x128xf32> to vector<16x128xbf16>
    %c0_20 = arith.constant 0 : index
    %c0_21 = arith.constant 0 : index
    %25 = vector.load %arg9[%c0_20, %c0_21] : memref<128x128xbf16, #tpu.memory_space<vmem>>, vector<128x128xbf16>
    %cst_22 = arith.constant dense<0.000000e+00> : vector<16x128xf32>
    %26 = tpu.matmul %24, %25, %cst_22 {dimension_numbers = #tpu.dot_dimension_numbers<[1], [0], [0], [1], [0, 0, 1, 1], [], []>} : vector<16x128xbf16>, vector<128x128xbf16>, vector<16x128xf32> -> vector<16x128xf32>
    %27 = arith.truncf %23 : vector<16x128xf32> to vector<16x128xbf16>
    %c0_23 = arith.constant 0 : index
    %c0_24 = arith.constant 0 : index
    %28 = vector.load %arg10[%c0_23, %c0_24] : memref<128x128xbf16, #tpu.memory_space<vmem>>, vector<128x128xbf16>
    %cst_25 = arith.constant dense<0.000000e+00> : vector<16x128xf32>
    %29 = tpu.matmul %27, %28, %cst_25 {dimension_numbers = #tpu.dot_dimension_numbers<[1], [0], [0], [1], [0, 0, 1, 1], [], []>} : vector<16x128xbf16>, vector<128x128xbf16>, vector<16x128xf32> -> vector<16x128xf32>
    %30 = arith.addf %26, %29 : vector<16x128xf32>
    %c0_26 = arith.constant 0 : index
    %c0_27 = arith.constant 0 : index
    %31 = vector.load %arg11[%c0_26, %c0_27] : memref<1x128xf32, #tpu.memory_space<vmem>>, vector<1x128xf32>
    %32 = vector.broadcast %31 : vector<1x128xf32> to vector<16x128xf32>
    %33 = arith.addf %30, %32 : vector<16x128xf32>
    %cst_28 = arith.constant 0.000000e+00 : f32
    %34 = vector.broadcast %cst_28 : f32 to vector<16x128xf32>
    %35 = arith.maximumf %33, %34 : vector<16x128xf32>
    %36 = arith.truncf %35 : vector<16x128xf32> to vector<16x128xbf16>
    %c0_29 = arith.constant 0 : index
    %c0_30 = arith.constant 0 : index
    %37 = vector.load %arg12[%c0_29, %c0_30] : memref<128x128xbf16, #tpu.memory_space<vmem>>, vector<128x128xbf16>
    %cst_31 = arith.constant dense<0.000000e+00> : vector<16x128xf32>
    %38 = tpu.matmul %36, %37, %cst_31 {dimension_numbers = #tpu.dot_dimension_numbers<[1], [0], [0], [1], [0, 0, 1, 1], [], []>} : vector<16x128xbf16>, vector<128x128xbf16>, vector<16x128xf32> -> vector<16x128xf32>
    %c0_32 = arith.constant 0 : index
    %c0_33 = arith.constant 0 : index
    %39 = vector.load %arg13[%c0_32, %c0_33] : memref<1x128xf32, #tpu.memory_space<vmem>>, vector<1x128xf32>
    %40 = vector.broadcast %39 : vector<1x128xf32> to vector<16x128xf32>
    %41 = arith.addf %38, %40 : vector<16x128xf32>
    %cst_34 = arith.constant 0.000000e+00 : f32
    %42 = vector.broadcast %cst_34 : f32 to vector<16x128xf32>
    %43 = arith.maximumf %41, %42 : vector<16x128xf32>
    %44 = arith.truncf %43 : vector<16x128xf32> to vector<16x128xbf16>
    %c0_35 = arith.constant 0 : index
    %c0_36 = arith.constant 0 : index
    %45 = vector.load %arg14[%c0_35, %c0_36] : memref<128x128xbf16, #tpu.memory_space<vmem>>, vector<128x128xbf16>
    %cst_37 = arith.constant dense<0.000000e+00> : vector<16x128xf32>
    %46 = tpu.matmul %44, %45, %cst_37 {dimension_numbers = #tpu.dot_dimension_numbers<[1], [0], [0], [1], [0, 0, 1, 1], [], []>} : vector<16x128xbf16>, vector<128x128xbf16>, vector<16x128xf32> -> vector<16x128xf32>
    %c0_38 = arith.constant 0 : index
    %c0_39 = arith.constant 0 : index
    %47 = vector.load %arg15[%c0_38, %c0_39] : memref<1x128xf32, #tpu.memory_space<vmem>>, vector<1x128xf32>
    %48 = vector.broadcast %47 : vector<1x128xf32> to vector<16x128xf32>
    %49 = arith.addf %46, %48 : vector<16x128xf32>
    %cst_40 = arith.constant 0.000000e+00 : f32
    %50 = vector.broadcast %cst_40 : f32 to vector<16x128xf32>
    %51 = arith.maximumf %49, %50 : vector<16x128xf32>
    %52 = arith.truncf %51 : vector<16x128xf32> to vector<16x128xbf16>
    %c0_41 = arith.constant 0 : index
    %c0_42 = arith.constant 0 : index
    %53 = vector.load %arg16[%c0_41, %c0_42] : memref<128x128xbf16, #tpu.memory_space<vmem>>, vector<128x128xbf16>
    %cst_43 = arith.constant dense<0.000000e+00> : vector<16x128xf32>
    %54 = tpu.matmul %52, %53, %cst_43 {dimension_numbers = #tpu.dot_dimension_numbers<[1], [0], [0], [1], [0, 0, 1, 1], [], []>} : vector<16x128xbf16>, vector<128x128xbf16>, vector<16x128xf32> -> vector<16x128xf32>
    %c0_44 = arith.constant 0 : index
    %c0_45 = arith.constant 0 : index
    %55 = vector.load %arg17[%c0_44, %c0_45] : memref<1x128xf32, #tpu.memory_space<vmem>>, vector<1x128xf32>
    %56 = vector.broadcast %55 : vector<1x128xf32> to vector<16x128xf32>
    %57 = arith.addf %54, %56 : vector<16x128xf32>
    %c0_46 = arith.constant 0 : index
    %c0_47 = arith.constant 0 : index
    %58 = vector.load %arg18[%c0_46, %c0_47] : memref<16x128xf32, #tpu.memory_space<vmem>>, vector<16x128xf32>
    tpu.vector_store %arg18[%c0_46, %c0_47], %57 {strides = array<i32>} : memref<16x128xf32, #tpu.memory_space<vmem>>, vector<16x128xf32>,
    return
  }
  func.func @transform_0(%arg0: i32) -> (i32, i32) {
    %c0_i32 = arith.constant 0 : i32
    %c0_i32_0 = arith.constant 0 : i32
    return %arg0, %c0_i32 : i32, i32
  }
  func.func @transform_1(%arg0: i32) -> (i32, i32) {
    %c0_i32 = arith.constant 0 : i32
    %c0_i32_0 = arith.constant 0 : i32
    return %arg0, %c0_i32 : i32, i32
  }
  func.func @transform_2(%arg0: i32) -> (i32, i32) {
    %c0_i32 = arith.constant 0 : i32
    %c0_i32_0 = arith.constant 0 : i32
    %c0_i32_1 = arith.constant 0 : i32
    return %c0_i32, %c0_i32_0 : i32, i32
  }
  func.func @transform_3(%arg0: i32) -> (i32, i32) {
    %c0_i32 = arith.constant 0 : i32
    %c0_i32_0 = arith.constant 0 : i32
    %c0_i32_1 = arith.constant 0 : i32
    return %c0_i32, %c0_i32_0 : i32, i32
  }
  func.func @transform_4(%arg0: i32) -> (i32, i32) {
    %c0_i32 = arith.constant 0 : i32
    %c0_i32_0 = arith.constant 0 : i32
    %c0_i32_1 = arith.constant 0 : i32
    return %c0_i32, %c0_i32_0 : i32, i32
  }
  func.func @transform_5(%arg0: i32) -> (i32, i32) {
    %c0_i32 = arith.constant 0 : i32
    %c0_i32_0 = arith.constant 0 : i32
    %c0_i32_1 = arith.constant 0 : i32
    return %c0_i32, %c0_i32_0 : i32, i32
  }
  func.func @transform_6(%arg0: i32) -> (i32, i32) {
    %c0_i32 = arith.constant 0 : i32
    %c0_i32_0 = arith.constant 0 : i32
    %c0_i32_1 = arith.constant 0 : i32
    return %c0_i32, %c0_i32_0 : i32, i32
  }
  func.func @transform_7(%arg0: i32) -> (i32, i32) {
    %c0_i32 = arith.constant 0 : i32
    %c0_i32_0 = arith.constant 0 : i32
    %c0_i32_1 = arith.constant 0 : i32
    return %c0_i32, %c0_i32_0 : i32, i32
  }
  func.func @transform_8(%arg0: i32) -> (i32, i32) {
    %c0_i32 = arith.constant 0 : i32
    %c0_i32_0 = arith.constant 0 : i32
    %c0_i32_1 = arith.constant 0 : i32
    return %c0_i32, %c0_i32_0 : i32, i32
  }
  func.func @transform_9(%arg0: i32) -> (i32, i32) {
    %c0_i32 = arith.constant 0 : i32
    %c0_i32_0 = arith.constant 0 : i32
    %c0_i32_1 = arith.constant 0 : i32
    return %c0_i32, %c0_i32_0 : i32, i32
  }
  func.func @transform_10(%arg0: i32) -> (i32, i32) {
    %c0_i32 = arith.constant 0 : i32
    %c0_i32_0 = arith.constant 0 : i32
    %c0_i32_1 = arith.constant 0 : i32
    return %c0_i32, %c0_i32_0 : i32, i32
  }
  func.func @transform_11(%arg0: i32) -> (i32, i32) {
    %c0_i32 = arith.constant 0 : i32
    %c0_i32_0 = arith.constant 0 : i32
    %c0_i32_1 = arith.constant 0 : i32
    return %c0_i32, %c0_i32_0 : i32, i32
  }
  func.func @transform_12(%arg0: i32) -> (i32, i32) {
    %c0_i32 = arith.constant 0 : i32
    %c0_i32_0 = arith.constant 0 : i32
    %c0_i32_1 = arith.constant 0 : i32
    return %c0_i32, %c0_i32_0 : i32, i32
  }
  func.func @transform_13(%arg0: i32) -> (i32, i32) {
    %c0_i32 = arith.constant 0 : i32
    %c0_i32_0 = arith.constant 0 : i32
    %c0_i32_1 = arith.constant 0 : i32
    return %c0_i32, %c0_i32_0 : i32, i32
  }
  func.func @transform_14(%arg0: i32) -> (i32, i32) {
    %c0_i32 = arith.constant 0 : i32
    %c0_i32_0 = arith.constant 0 : i32
    %c0_i32_1 = arith.constant 0 : i32
    return %c0_i32, %c0_i32_0 : i32, i32
  }
  func.func @transform_15(%arg0: i32) -> (i32, i32) {
    %c0_i32 = arith.constant 0 : i32
    %c0_i32_0 = arith.constant 0 : i32
    %c0_i32_1 = arith.constant 0 : i32
    return %c0_i32, %c0_i32_0 : i32, i32
  }
  func.func @transform_16(%arg0: i32) -> (i32, i32) {
    %c0_i32 = arith.constant 0 : i32
    %c0_i32_0 = arith.constant 0 : i32
    %c0_i32_1 = arith.constant 0 : i32
    return %c0_i32, %c0_i32_0 : i32, i32
  }
  func.func @transform_17(%arg0: i32) -> (i32, i32) {
    %c0_i32 = arith.constant 0 : i32
    %c0_i32_0 = arith.constant 0 : i32
    return %arg0, %c0_i32 : i32, i32
  }
}

</mosaic_0001>

<bundles_post_ra>
// kernel: multimodal_forward.4
= control target key start
LH: loop header
LB: loop body
LE: loop exit
PB: predicated region body
PF: predicated region fallthrough
CT: control target
= control target key end

     0   :  { %s994_s12 = smov 0   ;;  %s996_s13 = smov 0   ;;  %s1125_s0 = inlined_call_operand.vmem [shape: bf16[4,128,128], index: 0, kind: input, shape index: {}]   ;;  %s1126_s1 = inlined_call_operand.vmem [shape: bf16[128,128], index: 1, kind: input, shape index: {}]   ;;  %s1127_s2 = inlined_call_operand.vmem [shape: f32[1,128], index: 2, kind: input, shape index: {}]   ;;  %s1128_s3 = inlined_call_operand.vmem [shape: bf16[128,128], index: 3, kind: output, shape index: {}]  }
   0x1   :  { %s998_s14 = smov 0  }
   0x2 LB: > { %s744_s15 = sadd.s32 4294967295, %s972_s14   ;;  %s1011_s16 = sadd.s32 1, %s972_s14   ;;  %s972_s14 = sphi %s998_s14, %s1131_s14   ;;  %s968_s13 = sphi %s996_s13, %s1130_s13   ;;  %s964_s12 = sphi %s994_s12, %s1129_s12  }
   0x3   : > { %s17_s17 = ssub.s32 %s972_s14, %s1011_s16  ;;  %s20_s18 = sadd.s32 1, %s968_s13 }
   0x4   : > { %p18_p0 = scmp.eq.s32.totalorder %s17_s17, 0  ;;  %p27_p1 = scmp.ne.s32.totalorder %s968_s13, %s964_s12 }
   0x5   : > { %p28_p2 = scmp.eq.s32.totalorder %s972_s14, 0  ;;  %p747_p4 = scmp.ge.s32.totalorder %s972_s14, 2 }
   0x6   : > { %s1020_s19 = scalar_select %p18_p0, %s968_s13, %s20_s18  }
   0x7   : > { %p29_p3 = por %p28_p2, %p27_p1  ;;  %127 = sbr.rel (%p747_p4) target bundleno = 32 (0x20), region = 24 }
   0xc   : > { %130 = sbr.rel (!%p29_p3) target bundleno = 32 (0x20), region = 28  ;;  %s132_s20 = sand.u32 (%p29_p3), 1, %s968_s13  }
   0xd   : > { %s853_s21 = sshll.u32 (%p29_p3), %s972_s14, 5  ;;  %s748_s22 = sshll.u32 (%p29_p3), %s132_s20, 7 }
   0xe   : > { %s1028_s25 = scalar_lea.vmem (%p29_p3), %s1125_s0, %s853_s21  ;;  %s134_s26 = scalar_lea.vmem (%p29_p3), [#allocation2], %s748_s22 }
   0xf   : > { %v154_v0 = vld [vmem:[%s1028_s25] sm:$0xff] (%p29_p3)   ;;  %v158_v1 = vld [vmem:[%s1028_s25 + $0x8] sm:$0xff] (%p29_p3)   ;;  %v162_v2 = vld [vmem:[%s1028_s25 + $0x10] sm:$0xff] (%p29_p3)  }
  0x10   : > { %155 = vst [vmem:[%s134_s26] sm:$0xff] (%p29_p3), %v154_v0   ;;  %v166_v3 = vld [vmem:[%s1028_s25 + $0x18] sm:$0xff] (%p29_p3)   ;;  %v170_v4 = vld [vmem:[%s1028_s25 + $0x40] sm:$0xff] (%p29_p3)   ;;  %v174_v5 = vld [vmem:[%s1028_s25 + $0x48] sm:$0xff] (%p29_p3)  }
  0x11   : > { %159 = vst [vmem:[%s134_s26 + $0x8] sm:$0xff] %v158_v1   ;;  %v178_v6 = vld [vmem:[%s1028_s25 + $0x50] sm:$0xff]   ;;  %v182_v7 = vld [vmem:[%s1028_s25 + $0x58] sm:$0xff]   ;;  %v186_v8 = vld [vmem:[%s1028_s25 + $0x80] sm:$0xff]  }
  0x12   : > { %163 = vst [vmem:[%s134_s26 + $0x10] sm:$0xff] %v162_v2   ;;  %v190_v9 = vld [vmem:[%s1028_s25 + $0x88] sm:$0xff]   ;;  %v194_v10 = vld [vmem:[%s1028_s25 + $0x90] sm:$0xff]   ;;  %v198_v11 = vld [vmem:[%s1028_s25 + $0x98] sm:$0xff]  }
  0x13   : > { %167 = vst [vmem:[%s134_s26 + $0x18] sm:$0xff] %v166_v3   ;;  %v202_v12 = vld [vmem:[%s1028_s25 + $0xc0] sm:$0xff]   ;;  %v206_v13 = vld [vmem:[%s1028_s25 + $0xc8] sm:$0xff]   ;;  %v210_v14 = vld [vmem:[%s1028_s25 + $0xd0] sm:$0xff]  }
  0x14   : > { %171 = vst [vmem:[%s134_s26 + $0x20] sm:$0xff] %v170_v4   ;;  %v214_v15 = vld [vmem:[%s1028_s25 + $0xd8] sm:$0xff]  }
  0x15   : > { %175 = vst [vmem:[%s134_s26 + $0x28] sm:$0xff] %v174_v5  }
  0x16   : > { %179 = vst [vmem:[%s134_s26 + $0x30] sm:$0xff] %v178_v6  }
  0x17   : > { %183 = vst [vmem:[%s134_s26 + $0x38] sm:$0xff] %v182_v7  }
  0x18   : > { %187 = vst [vmem:[%s134_s26 + $0x40] sm:$0xff] %v186_v8  }
  0x19   : > { %191 = vst [vmem:[%s134_s26 + $0x48] sm:$0xff] %v190_v9  }
  0x1a   : > { %195 = vst [vmem:[%s134_s26 + $0x50] sm:$0xff] %v194_v10  }
  0x1b   : > { %199 = vst [vmem:[%s134_s26 + $0x58] sm:$0xff] %v198_v11  }
  0x1c   : > { %203 = vst [vmem:[%s134_s26 + $0x60] sm:$0xff] %v202_v12  }
  0x1d   : > { %207 = vst [vmem:[%s134_s26 + $0x68] sm:$0xff] %v206_v13  }
  0x1e   : > { %211 = vst [vmem:[%s134_s26 + $0x70] sm:$0xff] %v210_v14  }
  0x1f   : > { %215 = vst [vmem:[%s134_s26 + $0x78] sm:$0xff] %v214_v15  }
  0x20 PF: > { %p751_p5 = scmp.ge.s32.totalorder %s972_s14, 1  ;;  %p304_p6 = scmp.lt.s32.totalorder %s972_s14, 3 }
  0x22   : > { %p305_p7 = pnand %p751_p5, %p304_p6 }
  0x23   : > { %s311_s17 = sand.u32 (!%p305_p7), 1, %s964_s12   ;;  %s753_s12 = sshll.u32 (!%p305_p7), %s744_s15, 3 }
  0x24   : > { %308 = sbr.rel (%p305_p7) target bundleno = 273 (0x111), region = 69  ;;  %s752_s21 = sshll.u32 (!%p305_p7), %s311_s17, 7 }
  0x25   : > { %s1073_s24 = scalar_lea.vmem (!%p305_p7), [#allocation2], %s752_s21  ;;  %p336_p8 = scmp.lt.s32.totalorder (!%p305_p7), %s753_s12, 15 }
  0x29   : > { %v877_v16 = vld [vmem:[%s1126_s1 + $0x38] sm:$0xff]  ;;  %v876_v17 = vld [vmem:[%s1126_s1 + $0x30] sm:$0xff]  ;;  %v875_v18 = vld [vmem:[%s1126_s1 + $0x28] sm:$0xff]  ;;  %s1133_s12 = smov (!%p336_p8, %s753_s12), 15 }
  0x2a   : > { %533 = vmatpush.bf16.msra.mxu0 %v877_v16  ;;  %901 = vmatpush.bf16.msra.mxu1 %v877_v16  ;;  %v874_v19 = vld [vmem:[%s1126_s1 + $0x20] sm:$0xff]  ;;  %v873_v20 = vld [vmem:[%s1126_s1 + $0x18] sm:$0xff]  ;;  %v872_v21 = vld [vmem:[%s1126_s1 + $0x10] sm:$0xff]  ;;  %s754_s14 = sshll.u32 %s1133_s12, 2 }
  0x2b   : > { %902 = vmatpush.bf16.msra.mxu2 %v877_v16  ;;  %903 = vmatpush.bf16.msra.mxu3 %v877_v16  ;;  %v871_v22 = vld [vmem:[%s1126_s1 + $0x8] sm:$0xff]  ;;  %v870_v23 = vld [vmem:[%s1126_s1] sm:$0xff]  ;;  %v856_v32 = vld [vmem:[%s1073_s24 + $0x10] sm:$0xff]  ;;  %s1103_s28 = scalar_lea.vmem %s1128_s3, %s754_s14 }
  0x2c   : > { %v854_v24 = vld [vmem:[%s1073_s24] sm:$0xff]  ;;  %v855_v28 = vld [vmem:[%s1073_s24 + $0x8] sm:$0xff]  ;;  %v860_v33 = vld [vmem:[%s1073_s24 + $0x30] sm:$0xff] }
  0x2d   : > { %v858_v25 = vld [vmem:[%s1073_s24 + $0x20] sm:$0xff]  ;;  %v859_v29 = vld [vmem:[%s1073_s24 + $0x28] sm:$0xff]  ;;  %v864_v34 = vld [vmem:[%s1073_s24 + $0x50] sm:$0xff] }
  0x2e   : > { %534 = vmatpush.bf16.msra.mxu0 %v876_v17  ;;  %904 = vmatpush.bf16.msra.mxu1 %v876_v17  ;;  %v862_v26 = vld [vmem:[%s1073_s24 + $0x40] sm:$0xff]  ;;  %v863_v30 = vld [vmem:[%s1073_s24 + $0x48] sm:$0xff]  ;;  %v868_v35 = vld [vmem:[%s1073_s24 + $0x70] sm:$0xff] }
  0x2f   : > { %905 = vmatpush.bf16.msra.mxu2 %v876_v17  ;;  %906 = vmatpush.bf16.msra.mxu3 %v876_v17  ;;  %v866_v27 = vld [vmem:[%s1073_s24 + $0x60] sm:$0xff]  ;;  %v867_v31 = vld [vmem:[%s1073_s24 + $0x68] sm:$0xff]  ;;  %v857_v36 = vld [vmem:[%s1073_s24 + $0x18] sm:$0xff] }
  0x30   : > { %v861_v37 = vld [vmem:[%s1073_s24 + $0x38] sm:$0xff]  ;;  %v1096_v49 = vld [vmem:[%s1127_s2] ss:$0 sm:$0xff] }
  0x31   : > { %v865_v38 = vld [vmem:[%s1073_s24 + $0x58] sm:$0xff] }
  0x32   : > { %535 = vmatpush.bf16.msra.mxu0 %v875_v18  ;;  %907 = vmatpush.bf16.msra.mxu1 %v875_v18  ;;  %v869_v39 = vld [vmem:[%s1073_s24 + $0x78] sm:$0xff] }
  0x33   : > { %908 = vmatpush.bf16.msra.mxu2 %v875_v18  ;;  %909 = vmatpush.bf16.msra.mxu3 %v875_v18 }
  0x36   : > { %536 = vmatpush.bf16.msra.mxu0 %v874_v19  ;;  %910 = vmatpush.bf16.msra.mxu1 %v874_v19 }
  0x37   : > { %911 = vmatpush.bf16.msra.mxu2 %v874_v19  ;;  %912 = vmatpush.bf16.msra.mxu3 %v874_v19 }
  0x3a   : > { %537 = vmatpush.bf16.msra.mxu0 %v873_v20  ;;  %913 = vmatpush.bf16.msra.mxu1 %v873_v20 }
  0x3b   : > { %914 = vmatpush.bf16.msra.mxu2 %v873_v20  ;;  %915 = vmatpush.bf16.msra.mxu3 %v873_v20 }
  0x3e   : > { %538 = vmatpush.bf16.msra.mxu0 %v872_v21  ;;  %916 = vmatpush.bf16.msra.mxu1 %v872_v21 }
  0x3f   : > { %917 = vmatpush.bf16.msra.mxu2 %v872_v21  ;;  %918 = vmatpush.bf16.msra.mxu3 %v872_v21 }
  0x42   : > { %539 = vmatpush.bf16.msra.mxu0 %v871_v22  ;;  %919 = vmatpush.bf16.msra.mxu1 %v871_v22 }
  0x43   : > { %920 = vmatpush.bf16.msra.mxu2 %v871_v22  ;;  %921 = vmatpush.bf16.msra.mxu3 %v871_v22 }
  0x46   : > { %540 = vmatpush.bf16.msra.mxu0 %v870_v23  ;;  %922 = vmatpush.bf16.msra.mxu1 %v870_v23 }
  0x47   : > { %923 = vmatpush.bf16.msra.mxu2 %v870_v23  ;;  %924 = vmatpush.bf16.msra.mxu3 %v870_v23 }
  0x49   : > { %541 = vmatmul.bf16.vlgmr.msra.gmra.mxu0 %v854_v24  ;;  %561 = vmatmul.bf16.vlgmr.msra.gmra.mxu1 %v858_v25 }
  0x4a   : > { %581 = vmatmul.bf16.vlgmr.msra.gmra.mxu2 %v862_v26  ;;  %601 = vmatmul.bf16.vlgmr.msra.gmra.mxu3 %v866_v27 }
  0x59   : > { %546 = vmatmul.bf16.gmra.mxu0 %v855_v28  ;;  %566 = vmatmul.bf16.gmra.mxu1 %v859_v29 }
  0x5a   : > { %586 = vmatmul.bf16.gmra.mxu2 %v863_v30  ;;  %606 = vmatmul.bf16.gmra.mxu3 %v867_v31 }
  0x69   : > { %551 = vmatmul.bf16.gmra.mxu0 %v856_v32  ;;  %571 = vmatmul.bf16.gmra.mxu1 %v860_v33 }
  0x6a   : > { %591 = vmatmul.bf16.gmra.mxu2 %v864_v34  ;;  %611 = vmatmul.bf16.gmra.mxu3 %v868_v35 }
  0x79   : > { %556 = vmatmul.bf16.gmra.mxu0 %v857_v36  ;;  %576 = vmatmul.bf16.gmra.mxu1 %v861_v37 }
  0x7a   : > { %596 = vmatmul.bf16.gmra.mxu2 %v865_v38  ;;  %616 = vmatmul.bf16.gmra.mxu3 %v869_v39 }
  0xc6   : > { %v542_v40 = vpop.f32.mrf.mxu0  ;;  %v562_v41 = vpop.f32.mrf.mxu1 }
  0xc7   : > { %v622_v42 = vmax.f32 %v542_v40, %v562_v41 }
  0xcd   : > { %v582_v43 = vpop.f32.mrf.mxu2  ;;  %v602_v44 = vpop.f32.mrf.mxu3 }
  0xce   : > { %v544_v45 = vpop.f32.mrf.mxu0  ;;  %v564_v46 = vpop.f32.mrf.mxu1  ;;  %v623_v47 = vmax.f32 %v622_v42, %v582_v43 }
  0xcf   : > { %v625_v50 = vmax.f32 %v544_v45, %v564_v46 }
  0xd0   : > { %v624_v48 = vmax.f32 %v623_v47, %v602_v44 }
  0xd2   : > { %v650_v56 = vadd.f32 %v1096_v49, %v624_v48 }
  0xd4   : > { %v658_v59 = vmax.f32 %v650_v56, 0.0 }
  0xd5   : > { %v584_v51 = vpop.f32.mrf.mxu2  ;;  %v604_v52 = vpop.f32.mrf.mxu3 }
  0xd6   : > { %v626_v53 = vmax.f32 %v625_v50, %v584_v51  ;;  %v547_v54 = vpop.f32.mrf.mxu0  ;;  %v567_v55 = vpop.f32.mrf.mxu1 }
  0xd7   : > { %v628_v61 = vmax.f32 %v547_v54, %v567_v55 }
  0xd8   : > { %v627_v57 = vmax.f32 %v626_v53, %v604_v52 }
  0xda   : > { %v651_v58 = vadd.f32 %v1096_v49, %v627_v57 }
  0xdc   : > { %v659_v60 = vmax.f32 %v651_v58, 0.0 }
  0xdd   : > { %v587_v62 = vpop.f32.mrf.mxu2  ;;  %v607_v63 = vpop.f32.mrf.mxu3 }
  0xde   : > { %v881_v0 = vpack.c.bf16 %v659_v60, %v658_v59  ;;  %v549_v1 = vpop.f32.mrf.mxu0  ;;  %v569_v2 = vpop.f32.mrf.mxu1  ;;  %v629_v3 = vmax.f32 %v628_v61, %v587_v62 }
  0xdf   : > { %v631_v5 = vmax.f32 %v549_v1, %v569_v2 }
  0xe0   : > { %882 = vst [vmem:[%s1103_s28] sm:$0xff] %v881_v0   ;;  %v630_v4 = vmax.f32 %v629_v3, %v607_v63 }
  0xe2   : > { %v652_v11 = vadd.f32 %v1096_v49, %v630_v4 }
  0xe4   : > { %v660_v14 = vmax.f32 %v652_v11, 0.0 }
  0xe5   : > { %v589_v6 = vpop.f32.mrf.mxu2  ;;  %v609_v7 = vpop.f32.mrf.mxu3 }
  0xe6   : > { %v632_v8 = vmax.f32 %v631_v5, %v589_v6  ;;  %v552_v9 = vpop.f32.mrf.mxu0  ;;  %v572_v10 = vpop.f32.mrf.mxu1 }
  0xe7   : > { %v634_v16 = vmax.f32 %v552_v9, %v572_v10 }
  0xe8   : > { %v633_v12 = vmax.f32 %v632_v8, %v609_v7 }
  0xea   : > { %v653_v13 = vadd.f32 %v1096_v49, %v633_v12 }
  0xec   : > { %v661_v15 = vmax.f32 %v653_v13, 0.0 }
  0xed   : > { %v592_v17 = vpop.f32.mrf.mxu2  ;;  %v612_v18 = vpop.f32.mrf.mxu3 }
  0xee   : > { %v886_v19 = vpack.c.bf16 %v661_v15, %v660_v14  ;;  %v554_v20 = vpop.f32.mrf.mxu0  ;;  %v574_v21 = vpop.f32.mrf.mxu1  ;;  %v635_v22 = vmax.f32 %v634_v16, %v592_v17 }
  0xef   : > { %v637_v24 = vmax.f32 %v554_v20, %v574_v21 }
  0xf0   : > { %898 = vst [vmem:[%s1103_s28 + $0x8] sm:$0xff] %v886_v19   ;;  %v636_v23 = vmax.f32 %v635_v22, %v612_v18 }
  0xf2   : > { %v654_v30 = vadd.f32 %v1096_v49, %v636_v23 }
  0xf4   : > { %v662_v33 = vmax.f32 %v654_v30, 0.0 }
  0xf5   : > { %v594_v25 = vpop.f32.mrf.mxu2  ;;  %v614_v26 = vpop.f32.mrf.mxu3 }
  0xf6   : > { %v638_v27 = vmax.f32 %v637_v24, %v594_v25  ;;  %v557_v28 = vpop.f32.mrf.mxu0  ;;  %v577_v29 = vpop.f32.mrf.mxu1 }
  0xf7   : > { %v640_v35 = vmax.f32 %v557_v28, %v577_v29 }
  0xf8   : > { %v639_v31 = vmax.f32 %v638_v27, %v614_v26 }
  0xfa   : > { %v655_v32 = vadd.f32 %v1096_v49, %v639_v31 }
  0xfc   : > { %v663_v34 = vmax.f32 %v655_v32, 0.0 }
  0xfd   : > { %v597_v36 = vpop.f32.mrf.mxu2  ;;  %v617_v37 = vpop.f32.mrf.mxu3 }
  0xfe   : > { %v891_v38 = vpack.c.bf16 %v663_v34, %v662_v33  ;;  %v641_v39 = vmax.f32 %v640_v35, %v597_v36  ;;  %v559_v40 = vpop.f32.mrf.mxu0  ;;  %v579_v41 = vpop.f32.mrf.mxu1 }
  0xff   : > { %v643_v43 = vmax.f32 %v559_v40, %v579_v41 }
 0x100   : > { %899 = vst [vmem:[%s1103_s28 + $0x10] sm:$0xff] %v891_v38   ;;  %v642_v42 = vmax.f32 %v641_v39, %v617_v37 }
 0x102   : > { %v656_v47 = vadd.f32 %v1096_v49, %v642_v42 }
 0x104   : > { %v664_v51 = vmax.f32 %v656_v47, 0.0 }
 0x105   : > { %v599_v44 = vpop.f32.mrf.mxu2  ;;  %v619_v46 = vpop.f32.mrf.mxu3 }
 0x106   : > { %v644_v45 = vmax.f32 %v643_v43, %v599_v44 }
 0x108   : > { %v645_v48 = vmax.f32 %v644_v45, %v619_v46 }
 0x10a   : > { %v657_v50 = vadd.f32 %v1096_v49, %v645_v48 }
 0x10c   : > { %v665_v52 = vmax.f32 %v657_v50, 0.0 }
 0x10e   : > { %v896_v53 = vpack.c.bf16 %v665_v52, %v664_v51 }
 0x110   : > { %900 = vst [vmem:[%s1103_s28 + $0x18] sm:$0xff] %v896_v53  }
 0x111 PF: > { %p10_p9 = scmp.ge.s32.totalorder %s1011_s16, 4   ;;  %s1129_s12 = smov %s968_s13 }
 0x112   : > { %s1130_s13 = smov %s1020_s19  ;;  %s1131_s14 = smov %s1011_s16 }
 0x113   :  { %12 = sbr.rel (!%p10_p9) target bundleno = 2 (0x2), region = 108 }

// kernel: multimodal_forward.5
= control target key start
LH: loop header
LB: loop body
LE: loop exit
PB: predicated region body
PF: predicated region fallthrough
CT: control target
= control target key end

     0   :  { %s622_s12 = smov 0   ;;  %s624_s13 = smov 0   ;;  %s701_s0 = inlined_call_operand.vmem [shape: bf16[4,32,128], index: 0, kind: input, shape index: {}]   ;;  %s702_s1 = inlined_call_operand.vmem [shape: bf16[128,128], index: 1, kind: input, shape index: {}]   ;;  %s703_s2 = inlined_call_operand.vmem [shape: f32[1,128], index: 2, kind: input, shape index: {}]   ;;  %s704_s3 = inlined_call_operand.vmem [shape: bf16[32,128], index: 3, kind: output, shape index: {}]  }
   0x1   :  { %s626_s14 = smov 0  }
   0x2 LB: > { %s450_s15 = sadd.s32 4294967295, %s600_s14   ;;  %s639_s16 = sadd.s32 1, %s600_s14   ;;  %s600_s14 = sphi %s626_s14, %s707_s14   ;;  %s596_s13 = sphi %s624_s13, %s706_s13   ;;  %s592_s12 = sphi %s622_s12, %s705_s12  }
   0x3   : > { %s17_s17 = ssub.s32 %s600_s14, %s639_s16  ;;  %s20_s18 = sadd.s32 1, %s596_s13 }
   0x4   : > { %p18_p0 = scmp.eq.s32.totalorder %s17_s17, 0  ;;  %p27_p1 = scmp.ne.s32.totalorder %s596_s13, %s592_s12 }
   0x5   : > { %p28_p2 = scmp.eq.s32.totalorder %s600_s14, 0  ;;  %p453_p4 = scmp.ge.s32.totalorder %s600_s14, 2 }
   0x6   : > { %s648_s19 = scalar_select %p18_p0, %s596_s13, %s20_s18  }
   0x7   : > { %p29_p3 = por %p28_p2, %p27_p1  ;;  %127 = sbr.rel (%p453_p4) target bundleno = 20 (0x14), region = 24 }
   0xc   : > { %130 = sbr.rel (!%p29_p3) target bundleno = 20 (0x14), region = 28  ;;  %s132_s20 = sand.u32 (%p29_p3), 1, %s596_s13  }
   0xd   : > { %s511_s21 = sshll.u32 (%p29_p3), %s600_s14, 3  ;;  %s454_s22 = sshll.u32 (%p29_p3), %s132_s20, 5 }
   0xe   : > { %s137_s25 = scalar_lea.vmem (%p29_p3), %s701_s0, %s511_s21  ;;  %s134_s26 = scalar_lea.vmem (%p29_p3), [#allocation2], %s454_s22 }
   0xf   : > { %v154_v0 = vld [vmem:[%s137_s25] sm:$0xff] (%p29_p3)   ;;  %v158_v1 = vld [vmem:[%s137_s25 + $0x10] sm:$0xff] (%p29_p3)  }
  0x10   : > { %v162_v2 = vld [vmem:[%s137_s25 + $0x20] sm:$0xff] (%p29_p3)   ;;  %155 = vst [vmem:[%s134_s26] sm:$0xff] (%p29_p3), %v154_v0   ;;  %v166_v3 = vld [vmem:[%s137_s25 + $0x30] sm:$0xff] (%p29_p3)  }
  0x11   : > { %159 = vst [vmem:[%s134_s26 + $0x8] sm:$0xff] %v158_v1  }
  0x12   : > { %163 = vst [vmem:[%s134_s26 + $0x10] sm:$0xff] %v162_v2  }
  0x13   : > { %167 = vst [vmem:[%s134_s26 + $0x18] sm:$0xff] %v166_v3  }
  0x14 PF: > { %p457_p5 = scmp.ge.s32.totalorder %s600_s14, 1  ;;  %p208_p6 = scmp.lt.s32.totalorder %s600_s14, 3 }
  0x16   : > { %p209_p7 = pnand %p457_p5, %p208_p6 }
  0x17   : > { %s215_s17 = sand.u32 (!%p209_p7), 1, %s592_s12   ;;  %s459_s12 = sshll.u32 (!%p209_p7), %s450_s15, 1 }
  0x18   : > { %212 = sbr.rel (%p209_p7) target bundleno = 213 (0xd5), region = 69  ;;  %s458_s21 = sshll.u32 (!%p209_p7), %s215_s17, 5 }
  0x19   : > { %s217_s24 = scalar_lea.vmem (!%p209_p7), [#allocation2], %s458_s21  ;;  %p240_p8 = scmp.lt.s32.totalorder (!%p209_p7), %s459_s12, 3 }
  0x1d   : > { %v523_v4 = vld [vmem:[%s702_s1 + $0x38] sm:$0xff]  ;;  %v522_v5 = vld [vmem:[%s702_s1 + $0x30] sm:$0xff]  ;;  %v521_v6 = vld [vmem:[%s702_s1 + $0x28] sm:$0xff]  ;;  %s709_s12 = smov (!%p240_p8, %s459_s12), 3 }
  0x1e   : > { %341 = vmatpush.bf16.msra.mxu0 %v523_v4  ;;  %529 = vmatpush.bf16.msra.mxu1 %v523_v4  ;;  %v520_v7 = vld [vmem:[%s702_s1 + $0x20] sm:$0xff]  ;;  %v519_v8 = vld [vmem:[%s702_s1 + $0x18] sm:$0xff]  ;;  %v518_v9 = vld [vmem:[%s702_s1 + $0x10] sm:$0xff]  ;;  %s460_s27 = sshll.u32 %s709_s12, 2 }
  0x1f   : > { %530 = vmatpush.bf16.msra.mxu2 %v523_v4  ;;  %531 = vmatpush.bf16.msra.mxu3 %v523_v4  ;;  %v517_v10 = vld [vmem:[%s702_s1 + $0x8] sm:$0xff]  ;;  %v516_v11 = vld [vmem:[%s702_s1] sm:$0xff]  ;;  %v514_v14 = vld [vmem:[%s217_s24 + $0x10] sm:$0xff]  ;;  %s243_s28 = scalar_lea.vmem %s704_s3, %s460_s27 }
  0x20   : > { %v512_v12 = vld [vmem:[%s217_s24] sm:$0xff]  ;;  %v513_v13 = vld [vmem:[%s217_s24 + $0x8] sm:$0xff]  ;;  %v515_v15 = vld [vmem:[%s217_s24 + $0x18] sm:$0xff] }
  0x21   : > { %v577_v23 = vld [vmem:[%s703_s2] ss:$0 sm:$0xff] }
  0x22   : > { %342 = vmatpush.bf16.msra.mxu0 %v522_v5  ;;  %532 = vmatpush.bf16.msra.mxu1 %v522_v5 }
  0x23   : > { %533 = vmatpush.bf16.msra.mxu2 %v522_v5  ;;  %534 = vmatpush.bf16.msra.mxu3 %v522_v5 }
  0x26   : > { %343 = vmatpush.bf16.msra.mxu0 %v521_v6  ;;  %535 = vmatpush.bf16.msra.mxu1 %v521_v6 }
  0x27   : > { %536 = vmatpush.bf16.msra.mxu2 %v521_v6  ;;  %537 = vmatpush.bf16.msra.mxu3 %v521_v6 }
  0x2a   : > { %344 = vmatpush.bf16.msra.mxu0 %v520_v7  ;;  %538 = vmatpush.bf16.msra.mxu1 %v520_v7 }
  0x2b   : > { %539 = vmatpush.bf16.msra.mxu2 %v520_v7  ;;  %540 = vmatpush.bf16.msra.mxu3 %v520_v7 }
  0x2e   : > { %345 = vmatpush.bf16.msra.mxu0 %v519_v8  ;;  %541 = vmatpush.bf16.msra.mxu1 %v519_v8 }
  0x2f   : > { %542 = vmatpush.bf16.msra.mxu2 %v519_v8  ;;  %543 = vmatpush.bf16.msra.mxu3 %v519_v8 }
  0x32   : > { %346 = vmatpush.bf16.msra.mxu0 %v518_v9  ;;  %544 = vmatpush.bf16.msra.mxu1 %v518_v9 }
  0x33   : > { %545 = vmatpush.bf16.msra.mxu2 %v518_v9  ;;  %546 = vmatpush.bf16.msra.mxu3 %v518_v9 }
  0x36   : > { %347 = vmatpush.bf16.msra.mxu0 %v517_v10  ;;  %547 = vmatpush.bf16.msra.mxu1 %v517_v10 }
  0x37   : > { %548 = vmatpush.bf16.msra.mxu2 %v517_v10  ;;  %549 = vmatpush.bf16.msra.mxu3 %v517_v10 }
  0x3a   : > { %348 = vmatpush.bf16.msra.mxu0 %v516_v11  ;;  %550 = vmatpush.bf16.msra.mxu1 %v516_v11 }
  0x3b   : > { %551 = vmatpush.bf16.msra.mxu2 %v516_v11  ;;  %552 = vmatpush.bf16.msra.mxu3 %v516_v11 }
  0x3d   : > { %349 = vmatmul.bf16.vlgmr.msra.gmra.mxu0 %v512_v12  ;;  %354 = vmatmul.bf16.vlgmr.msra.gmra.mxu1 %v513_v13 }
  0x3e   : > { %359 = vmatmul.bf16.vlgmr.msra.gmra.mxu2 %v514_v14  ;;  %364 = vmatmul.bf16.vlgmr.msra.gmra.mxu3 %v515_v15 }
  0xba   : > { %v350_v16 = vpop.f32.mrf.mxu0  ;;  %v355_v17 = vpop.f32.mrf.mxu1 }
  0xc1   : > { %v360_v18 = vpop.f32.mrf.mxu2  ;;  %v365_v19 = vpop.f32.mrf.mxu3 }
  0xc2   : > { %v370_v20 = vmax.f32 %v350_v16, %v360_v18  ;;  %v371_v21 = vmax.f32 %v355_v17, %v365_v19  ;;  %v352_v24 = vpop.f32.mrf.mxu0  ;;  %v357_v25 = vpop.f32.mrf.mxu1 }
  0xc4   : > { %v372_v22 = vmax.f32 %v370_v20, %v371_v21 }
  0xc6   : > { %v380_v30 = vadd.f32 %v577_v23, %v372_v22 }
  0xc8   : > { %v382_v33 = vmax.f32 %v380_v30, 0.0 }
  0xc9   : > { %v362_v26 = vpop.f32.mrf.mxu2  ;;  %v367_v27 = vpop.f32.mrf.mxu3 }
  0xca   : > { %v373_v28 = vmax.f32 %v352_v24, %v362_v26  ;;  %v374_v29 = vmax.f32 %v357_v25, %v367_v27 }
  0xcc   : > { %v375_v31 = vmax.f32 %v373_v28, %v374_v29 }
  0xce   : > { %v381_v32 = vadd.f32 %v577_v23, %v375_v31 }
  0xd0   : > { %v383_v34 = vmax.f32 %v381_v32, 0.0 }
  0xd2   : > { %v527_v35 = vpack.c.bf16 %v383_v34, %v382_v33 }
  0xd4   : > { %528 = vst [vmem:[%s243_s28] sm:$0xff] %v527_v35  }
  0xd5 PF: > { %p10_p9 = scmp.ge.s32.totalorder %s639_s16, 4   ;;  %s705_s12 = smov %s596_s13 }
  0xd6   : > { %s706_s13 = smov %s648_s19  ;;  %s707_s14 = smov %s639_s16 }
  0xd7   :  { %12 = sbr.rel (!%p10_p9) target bundleno = 2 (0x2), region = 108 }

// kernel: multimodal_forward.6
= control target key start
LH: loop header
LB: loop body
LE: loop exit
PB: predicated region body
PF: predicated region fallthrough
CT: control target
= control target key end

     0   :  { %s534_s1 = inlined_call_operand.vmem [shape: bf16[256,128], index: 1, kind: input, shape index: {}]   ;;  %s535_s0 = inlined_call_operand.vmem [shape: bf16[4,16,256], index: 0, kind: input, shape index: {}]   ;;  %s536_s2 = inlined_call_operand.vmem [shape: f32[1,128], index: 2, kind: input, shape index: {}]   ;;  %s537_s3 = inlined_call_operand.vmem [shape: bf16[16,128], index: 3, kind: output, shape index: {}]  }
   0x1   :  { %v381_v0 = vld [vmem:[%s534_s1 + $0x38] sm:$0xff]  ;;  %v380_v2 = vld [vmem:[%s534_s1 + $0x30] sm:$0xff]  ;;  %v379_v4 = vld [vmem:[%s534_s1 + $0x28] sm:$0xff] }
   0x2   :  { %v389_v1 = vld [vmem:[%s534_s1 + $0x78] sm:$0xff]  ;;  %190 = vmatpush.bf16.msra.mxu0 %v381_v0  ;;  %395 = vmatpush.bf16.msra.mxu2 %v381_v0  ;;  %v388_v3 = vld [vmem:[%s534_s1 + $0x70] sm:$0xff]  ;;  %v387_v5 = vld [vmem:[%s534_s1 + $0x68] sm:$0xff] }
   0x3   :  { %219 = vmatpush.bf16.msra.mxu1 %v389_v1  ;;  %403 = vmatpush.bf16.msra.mxu3 %v389_v1  ;;  %v378_v6 = vld [vmem:[%s534_s1 + $0x20] sm:$0xff]  ;;  %v377_v8 = vld [vmem:[%s534_s1 + $0x18] sm:$0xff]  ;;  %v376_v10 = vld [vmem:[%s534_s1 + $0x10] sm:$0xff] }
   0x4   :  { %v386_v7 = vld [vmem:[%s534_s1 + $0x60] sm:$0xff]  ;;  %v385_v9 = vld [vmem:[%s534_s1 + $0x58] sm:$0xff]  ;;  %v384_v11 = vld [vmem:[%s534_s1 + $0x50] sm:$0xff] }
   0x5   :  { %v375_v12 = vld [vmem:[%s534_s1 + $0x8] sm:$0xff]  ;;  %v374_v14 = vld [vmem:[%s534_s1] sm:$0xff]  ;;  %v280_v28 = vld [vmem:[%s535_s0 + $0x10] sm:$0xf] }
   0x6   :  { %191 = vmatpush.bf16.msra.mxu0 %v380_v2  ;;  %396 = vmatpush.bf16.msra.mxu2 %v380_v2  ;;  %v383_v13 = vld [vmem:[%s534_s1 + $0x48] sm:$0xff]  ;;  %v382_v15 = vld [vmem:[%s534_s1 + $0x40] sm:$0xff]  ;;  %v369_v29 = vld [vmem:[%s535_s0 + $0x14] sm:$0xf0] }
   0x7   :  { %220 = vmatpush.bf16.msra.mxu1 %v388_v3  ;;  %404 = vmatpush.bf16.msra.mxu3 %v388_v3  ;;  %v272_v16 = vld [vmem:[%s535_s0] sm:$0xf]  ;;  %v367_v17 = vld [vmem:[%s535_s0 + $0x4] sm:$0xf0]  ;;  %v366_v20 = vld [vmem:[%s535_s0 + $0x4] sm:$0xf]  ;;  %v281_v36 = vor.u32 %v369_v29, %v280_v28 }
   0x8   :  { %v288_v18 = vld [vmem:[%s535_s0 + $0x20] sm:$0xf]  ;;  %v371_v19 = vld [vmem:[%s535_s0 + $0x24] sm:$0xf0]  ;;  %v274_v21 = vld [vmem:[%s535_s0 + $0x8] sm:$0xf0]  ;;  %v273_v24 = vor.u32 %v367_v17, %v272_v16 }
   0x9   :  { %v370_v22 = vld [vmem:[%s535_s0 + $0x24] sm:$0xf]  ;;  %v290_v23 = vld [vmem:[%s535_s0 + $0x28] sm:$0xf0]  ;;  %v289_v25 = vor.u32 %v371_v19, %v288_v18  ;;  %v277_v26 = vor.u32 %v366_v20, %v274_v21  ;;  %v296_v30 = vld [vmem:[%s535_s0 + $0x30] sm:$0xf] }
   0xa   :  { %192 = vmatpush.bf16.msra.mxu0 %v379_v4  ;;  %397 = vmatpush.bf16.msra.mxu2 %v379_v4  ;;  %v293_v27 = vor.u32 %v370_v22, %v290_v23  ;;  %v373_v31 = vld [vmem:[%s535_s0 + $0x34] sm:$0xf0]  ;;  %v368_v32 = vld [vmem:[%s535_s0 + $0x14] sm:$0xf]  ;;  %v282_v33 = vld [vmem:[%s535_s0 + $0x18] sm:$0xf0] }
   0xb   :  { %221 = vmatpush.bf16.msra.mxu1 %v387_v5  ;;  %405 = vmatpush.bf16.msra.mxu3 %v387_v5  ;;  %v372_v34 = vld [vmem:[%s535_s0 + $0x34] sm:$0xf]  ;;  %v298_v35 = vld [vmem:[%s535_s0 + $0x38] sm:$0xf0]  ;;  %v297_v37 = vor.u32 %v373_v31, %v296_v30  ;;  %v285_v38 = vor.u32 %v368_v32, %v282_v33  ;;  %v411_v1 = vld [vmem:[%s536_s2] ss:$0 sm:$0xff] }
   0xc   :  { %v301_v39 = vor.u32 %v372_v34, %v298_v35 }
   0xe   :  { %193 = vmatpush.bf16.msra.mxu0 %v378_v6  ;;  %398 = vmatpush.bf16.msra.mxu2 %v378_v6 }
   0xf   :  { %222 = vmatpush.bf16.msra.mxu1 %v386_v7  ;;  %406 = vmatpush.bf16.msra.mxu3 %v386_v7 }
  0x12   :  { %194 = vmatpush.bf16.msra.mxu0 %v377_v8  ;;  %399 = vmatpush.bf16.msra.mxu2 %v377_v8 }
  0x13   :  { %223 = vmatpush.bf16.msra.mxu1 %v385_v9  ;;  %407 = vmatpush.bf16.msra.mxu3 %v385_v9 }
  0x16   :  { %195 = vmatpush.bf16.msra.mxu0 %v376_v10  ;;  %400 = vmatpush.bf16.msra.mxu2 %v376_v10 }
  0x17   :  { %224 = vmatpush.bf16.msra.mxu1 %v384_v11  ;;  %408 = vmatpush.bf16.msra.mxu3 %v384_v11 }
  0x1a   :  { %196 = vmatpush.bf16.msra.mxu0 %v375_v12  ;;  %401 = vmatpush.bf16.msra.mxu2 %v375_v12 }
  0x1b   :  { %225 = vmatpush.bf16.msra.mxu1 %v383_v13  ;;  %409 = vmatpush.bf16.msra.mxu3 %v383_v13 }
  0x1e   :  { %197 = vmatpush.bf16.msra.mxu0 %v374_v14  ;;  %402 = vmatpush.bf16.msra.mxu2 %v374_v14 }
  0x1f   :  { %226 = vmatpush.bf16.msra.mxu1 %v382_v15  ;;  %410 = vmatpush.bf16.msra.mxu3 %v382_v15 }
  0x21   :  { %198 = vmatmul.bf16.vlgmr.msra.gmra.mxu0 %v273_v24  ;;  %208 = vmatmul.bf16.vlgmr.msra.gmra.mxu2 %v289_v25 }
  0x22   :  { %227 = vmatmul.bf16.vlgmr.msra.gmra.mxu1 %v277_v26  ;;  %237 = vmatmul.bf16.vlgmr.msra.gmra.mxu3 %v293_v27 }
  0x31   :  { %203 = vmatmul.bf16.gmra.mxu0 %v281_v36  ;;  %213 = vmatmul.bf16.gmra.mxu2 %v297_v37 }
  0x32   :  { %232 = vmatmul.bf16.gmra.mxu1 %v285_v38  ;;  %242 = vmatmul.bf16.gmra.mxu3 %v301_v39 }
  0x9e   :  { %v199_v40 = vpop.f32.mrf.mxu0 }
  0x9f   :  { %v228_v41 = vpop.f32.mrf.mxu1 }
  0xa0   :  { %v229_v54 = vadd.f32 %v228_v41, %v199_v40 }
  0xa4   :  { %v209_v42 = vpop.f32.mrf.mxu2 }
  0xa5   :  { %v238_v43 = vpop.f32.mrf.mxu3 }
  0xa6   :  { %v201_v44 = vpop.f32.mrf.mxu0  ;;  %v239_v55 = vadd.f32 %v238_v43, %v209_v42 }
  0xa7   :  { %v230_v45 = vpop.f32.mrf.mxu1 }
  0xa8   :  { %v248_v59 = vmax.f32 %v229_v54, %v239_v55  ;;  %v231_v63 = vadd.f32 %v230_v45, %v201_v44 }
  0xac   :  { %v211_v46 = vpop.f32.mrf.mxu2 }
  0xad   :  { %v240_v47 = vpop.f32.mrf.mxu3 }
  0xae   :  { %v204_v48 = vpop.f32.mrf.mxu0  ;;  %v241_v60 = vadd.f32 %v240_v47, %v211_v46 }
  0xaf   :  { %v233_v49 = vpop.f32.mrf.mxu1 }
  0xb0   :  { %v234_v52 = vadd.f32 %v233_v49, %v204_v48  ;;  %v251_v4 = vmax.f32 %v231_v63, %v241_v60 }
  0xb4   :  { %v214_v50 = vpop.f32.mrf.mxu2 }
  0xb5   :  { %v243_v51 = vpop.f32.mrf.mxu3 }
  0xb6   :  { %v244_v53 = vadd.f32 %v243_v51, %v214_v50  ;;  %v206_v57 = vpop.f32.mrf.mxu0 }
  0xb7   :  { %v235_v58 = vpop.f32.mrf.mxu1 }
  0xb8   :  { %v249_v56 = vmax.f32 %v234_v52, %v244_v53  ;;  %v236_v2 = vadd.f32 %v235_v58, %v206_v57 }
  0xba   :  { %v250_v0 = vmax.f32 %v248_v59, %v249_v56 }
  0xbc   :  { %v216_v61 = vpop.f32.mrf.mxu2  ;;  %v258_v6 = vadd.f32 %v411_v1, %v250_v0 }
  0xbd   :  { %v245_v62 = vpop.f32.mrf.mxu3 }
  0xbe   :  { %v246_v3 = vadd.f32 %v245_v62, %v216_v61  ;;  %v260_v9 = vmax.f32 %v258_v6, 0.0 }
  0xc0   :  { %v252_v5 = vmax.f32 %v236_v2, %v246_v3 }
  0xc2   :  { %v253_v7 = vmax.f32 %v251_v4, %v252_v5 }
  0xc4   :  { %v259_v8 = vadd.f32 %v411_v1, %v253_v7 }
  0xc6   :  { %v261_v10 = vmax.f32 %v259_v8, 0.0 }
  0xc8   :  { %v393_v11 = vpack.c.bf16 %v261_v10, %v260_v9 }
  0xca   :  { %394 = vst [vmem:[%s537_s3] sm:$0xff] %v393_v11  }

// kernel: multimodal_forward.7
= control target key start
LH: loop header
LB: loop body
LE: loop exit
PB: predicated region body
PF: predicated region fallthrough
CT: control target
= control target key end

     0   :  { %s1562_s4 = inlined_call_operand.vmem [shape: bf16[128,128], index: 4, kind: input, shape index: {}]   ;;  %s1563_s2 = inlined_call_operand.vmem [shape: bf16[256,128], index: 2, kind: input, shape index: {}]   ;;  %s1564_s6 = inlined_call_operand.vmem [shape: bf16[128,128], index: 6, kind: input, shape index: {}]   ;;  %s1565_s5 = inlined_call_operand.vmem [shape: f32[1,128], index: 5, kind: input, shape index: {}]   ;;  %s1566_s1 = inlined_call_operand.vmem [shape: bf16[16,128], index: 1, kind: input, shape index: {}]   ;;  %s1567_s3 = inlined_call_operand.vmem [shape: f32[1,128], index: 3, kind: input, shape index: {}]   ;;  %s1568_s0 = inlined_call_operand.vmem [shape: bf16[16,256], index: 0, kind: input, shape index: {}]   ;;  %s1569_s8 = inlined_call_operand.vmem [shape: bf16[128,128], index: 8, kind: input, shape index: {}]   ;;  %s1570_s7 = inlined_call_operand.vmem [shape: f32[1,128], index: 7, kind: input, shape index: {}]   ;;  %s1571_s9 = inlined_call_operand.vmem [shape: bf16[128,128], index: 9, kind: input, shape index: {}]   ;;  %s1572_s10 = inlined_call_operand.vmem [shape: f32[1,128], index: 10, kind: input, shape index: {}]   ;;  %s1573_s12 = inlined_call_operand.vmem [shape: f32[1,128], index: 12, kind: input, shape index: {}]   ;;  %s1574_s11 = inlined_call_operand.vmem [shape: bf16[128,128], index: 11, kind: input, shape index: {}]   ;;  %s1575_s13 = inlined_call_operand.vmem [shape: bf16[128,128], index: 13, kind: input, shape index: {}]   ;;  %s1576_s14 = inlined_call_operand.vmem [shape: f32[1,128], index: 14, kind: input, shape index: {}]   ;;  %s1577_s15 = inlined_call_operand.vmem [shape: bf16[128,128], index: 15, kind: input, shape index: {}]   ;;  %s1578_s16 = inlined_call_operand.vmem [shape: f32[1,128], index: 16, kind: input, shape index: {}]   ;;  %s1579_s17 = inlined_call_operand.vmem [shape: f32[16,128], index: 17, kind: output, shape index: {}]  }
   0x1   :  { %1582 = sst [smem:[#allocation2_spill]] %s1562_s4  ;;  %v1166_v6 = vld [vmem:[%s1564_s6 + $0x38] sm:$0xff]  ;;  %v1165_v8 = vld [vmem:[%s1564_s6 + $0x30] sm:$0xff]  ;;  %v1164_v12 = vld [vmem:[%s1564_s6 + $0x28] sm:$0xff] }
   0x2   :  { %1583 = sst [smem:[#allocation3_spill]] %s1563_s2  ;;  %391 = vmatpush.bf16.msra.mxu3 %v1166_v6  ;;  %v1163_v16 = vld [vmem:[%s1564_s6 + $0x20] sm:$0xff]  ;;  %v1162_v28 = vld [vmem:[%s1564_s6 + $0x18] sm:$0xff]  ;;  %v1133_v31 = vld [vmem:[%s1568_s0 + $0x4] sm:$0xf0] }
   0x3   :  { %s1584_s26 = sld [smem:[#allocation2_spill]]  ;;  %v1150_v26 = vld [vmem:[%s1566_s1] sm:$0xff]  ;;  %v1161_v33 = vld [vmem:[%s1564_s6 + $0x10] sm:$0xff]  ;;  %v836_v35 = vld [vmem:[%s1568_s0 + $0x8] sm:$0xf0] }
   0x4   :  { %s1585_s30 = sld [smem:[#allocation3_spill]]  ;;  %v834_v30 = vld [vmem:[%s1568_s0] sm:$0xf]  ;;  %v1132_v34 = vld [vmem:[%s1568_s0 + $0x4] sm:$0xf]  ;;  %v1160_v37 = vld [vmem:[%s1564_s6 + $0x8] sm:$0xff] }
   0x5   :  { %v835_v32 = vor.u32 %v1133_v31, %v834_v30  ;;  %v839_v36 = vor.u32 %v1132_v34, %v836_v35  ;;  %v1159_v38 = vld [vmem:[%s1564_s6] sm:$0xff]  ;;  %v1174_v39 = vld [vmem:[%s1569_s8 + $0x38] sm:$0xff]  ;;  %v1173_v40 = vld [vmem:[%s1569_s8 + $0x30] sm:$0xff] }
   0x6   :  { %392 = vmatpush.bf16.msra.mxu3 %v1165_v8  ;;  %v1172_v41 = vld [vmem:[%s1569_s8 + $0x28] sm:$0xff]  ;;  %v1171_v42 = vld [vmem:[%s1569_s8 + $0x20] sm:$0xff]  ;;  %v1182_v51 = vld [vmem:[%s1571_s9 + $0x38] sm:$0xff] }
   0x7   :  { %v1207_v44 = vld [vmem:[%s1565_s5] ss:$0 sm:$0xff]  ;;  %v1170_v52 = vld [vmem:[%s1569_s8 + $0x18] sm:$0xff]  ;;  %v1181_v53 = vld [vmem:[%s1571_s9 + $0x30] sm:$0xff] }
   0x8   :  { %v1169_v54 = vld [vmem:[%s1569_s8 + $0x10] sm:$0xff]  ;;  %v1180_v55 = vld [vmem:[%s1571_s9 + $0x28] sm:$0xff]  ;;  %v1179_v57 = vld [vmem:[%s1571_s9 + $0x20] sm:$0xff] }
   0x9   :  { %v1158_v0 = vld [vmem:[%s1584_s26 + $0x38] sm:$0xff]  ;;  %v1157_v1 = vld [vmem:[%s1584_s26 + $0x30] sm:$0xff]  ;;  %v1156_v7 = vld [vmem:[%s1584_s26 + $0x28] sm:$0xff] }
   0xa   :  { %306 = vmatpush.bf16.msra.mxu2 %v1158_v0  ;;  %v1141_v2 = vld [vmem:[%s1585_s30 + $0x38] sm:$0xff]  ;;  %v1140_v4 = vld [vmem:[%s1585_s30 + $0x30] sm:$0xff]  ;;  %v1139_v9 = vld [vmem:[%s1585_s30 + $0x28] sm:$0xff]  ;;  %393 = vmatpush.bf16.msra.mxu3 %v1164_v12 }
   0xb   :  { %v1149_v3 = vld [vmem:[%s1585_s30 + $0x78] sm:$0xff]  ;;  %200 = vmatpush.bf16.msra.mxu0 %v1141_v2  ;;  %v1148_v5 = vld [vmem:[%s1585_s30 + $0x70] sm:$0xff]  ;;  %v1147_v10 = vld [vmem:[%s1585_s30 + $0x68] sm:$0xff] }
   0xc   :  { %214 = vmatpush.bf16.msra.mxu1 %v1149_v3  ;;  %v1155_v11 = vld [vmem:[%s1584_s26 + $0x20] sm:$0xff]  ;;  %v1154_v15 = vld [vmem:[%s1584_s26 + $0x18] sm:$0xff]  ;;  %v1153_v19 = vld [vmem:[%s1584_s26 + $0x10] sm:$0xff] }
   0xd   :  { %v1138_v13 = vld [vmem:[%s1585_s30 + $0x20] sm:$0xff]  ;;  %v1137_v17 = vld [vmem:[%s1585_s30 + $0x18] sm:$0xff]  ;;  %v1136_v20 = vld [vmem:[%s1585_s30 + $0x10] sm:$0xff] }
   0xe   :  { %307 = vmatpush.bf16.msra.mxu2 %v1157_v1  ;;  %v1146_v14 = vld [vmem:[%s1585_s30 + $0x60] sm:$0xff]  ;;  %v1145_v18 = vld [vmem:[%s1585_s30 + $0x58] sm:$0xff]  ;;  %394 = vmatpush.bf16.msra.mxu3 %v1163_v16  ;;  %v1144_v21 = vld [vmem:[%s1585_s30 + $0x50] sm:$0xff] }
   0xf   :  { %201 = vmatpush.bf16.msra.mxu0 %v1140_v4  ;;  %v1152_v22 = vld [vmem:[%s1584_s26 + $0x8] sm:$0xff]  ;;  %v1151_v25 = vld [vmem:[%s1584_s26] sm:$0xff]  ;;  %v1177_v8 = vld [vmem:[%s1571_s9 + $0x10] sm:$0xff] }
  0x10   :  { %215 = vmatpush.bf16.msra.mxu1 %v1148_v5  ;;  %v1135_v23 = vld [vmem:[%s1585_s30 + $0x8] sm:$0xff]  ;;  %v1134_v27 = vld [vmem:[%s1585_s30] sm:$0xff] }
  0x11   :  { %v1143_v24 = vld [vmem:[%s1585_s30 + $0x48] sm:$0xff]  ;;  %v1142_v29 = vld [vmem:[%s1585_s30 + $0x40] sm:$0xff] }
  0x12   :  { %308 = vmatpush.bf16.msra.mxu2 %v1156_v7  ;;  %395 = vmatpush.bf16.msra.mxu3 %v1162_v28  ;;  %v1168_v56 = vld [vmem:[%s1569_s8 + $0x8] sm:$0xff]  ;;  %v1167_v58 = vld [vmem:[%s1569_s8] sm:$0xff]  ;;  %v1178_v7 = vld [vmem:[%s1571_s9 + $0x18] sm:$0xff] }
  0x13   :  { %202 = vmatpush.bf16.msra.mxu0 %v1139_v9  ;;  %v1208_v59 = vld [vmem:[%s1567_s3] ss:$0 sm:$0xff]  ;;  %v1176_v9 = vld [vmem:[%s1571_s9 + $0x8] sm:$0xff]  ;;  %v1197_v28 = vld [vmem:[%s1575_s13 + $0x30] sm:$0xff] }
  0x14   :  { %216 = vmatpush.bf16.msra.mxu1 %v1147_v10  ;;  %v1175_v10 = vld [vmem:[%s1571_s9] sm:$0xff] }
  0x15   :  { %v1209_v12 = vld [vmem:[%s1570_s7] ss:$0 sm:$0xff] }
  0x16   :  { %309 = vmatpush.bf16.msra.mxu2 %v1155_v11  ;;  %396 = vmatpush.bf16.msra.mxu3 %v1161_v33  ;;  %v1195_v30 = vld [vmem:[%s1575_s13 + $0x20] sm:$0xff] }
  0x17   :  { %203 = vmatpush.bf16.msra.mxu0 %v1138_v13  ;;  %v1210_v34 = vld [vmem:[%s1572_s10] ss:$0 sm:$0xff] }
  0x18   :  { %217 = vmatpush.bf16.msra.mxu1 %v1146_v14 }
  0x1a   :  { %310 = vmatpush.bf16.msra.mxu2 %v1154_v15  ;;  %397 = vmatpush.bf16.msra.mxu3 %v1160_v37 }
  0x1b   :  { %204 = vmatpush.bf16.msra.mxu0 %v1137_v17 }
  0x1c   :  { %218 = vmatpush.bf16.msra.mxu1 %v1145_v18 }
  0x1e   :  { %311 = vmatpush.bf16.msra.mxu2 %v1153_v19  ;;  %398 = vmatpush.bf16.msra.mxu3 %v1159_v38  ;;  %v1190_v19 = vld [vmem:[%s1574_s11 + $0x38] sm:$0xff] }
  0x1f   :  { %205 = vmatpush.bf16.msra.mxu0 %v1136_v20  ;;  %v1189_v20 = vld [vmem:[%s1574_s11 + $0x30] sm:$0xff] }
  0x20   :  { %219 = vmatpush.bf16.msra.mxu1 %v1144_v21  ;;  %v1188_v21 = vld [vmem:[%s1574_s11 + $0x28] sm:$0xff] }
  0x22   :  { %312 = vmatpush.bf16.msra.mxu2 %v1152_v22  ;;  %v1187_v22 = vld [vmem:[%s1574_s11 + $0x20] sm:$0xff] }
  0x23   :  { %206 = vmatpush.bf16.msra.mxu0 %v1135_v23  ;;  %v1186_v23 = vld [vmem:[%s1574_s11 + $0x18] sm:$0xff] }
  0x24   :  { %220 = vmatpush.bf16.msra.mxu1 %v1143_v24  ;;  %v1185_v24 = vld [vmem:[%s1574_s11 + $0x10] sm:$0xff] }
  0x26   :  { %313 = vmatpush.bf16.msra.mxu2 %v1151_v25  ;;  %v1184_v25 = vld [vmem:[%s1574_s11 + $0x8] sm:$0xff] }
  0x27   :  { %207 = vmatpush.bf16.msra.mxu0 %v1134_v27  ;;  %v1198_v27 = vld [vmem:[%s1575_s13 + $0x38] sm:$0xff] }
  0x28   :  { %221 = vmatpush.bf16.msra.mxu1 %v1142_v29  ;;  %727 = vmatpush.bf16.msrb.mxu3 %v1198_v27  ;;  %v1196_v29 = vld [vmem:[%s1575_s13 + $0x28] sm:$0xff] }
  0x29   :  { %314 = vmatmul.bf16.vlgmr.msra.gmra.mxu2 %v1150_v26  ;;  %v1183_v26 = vld [vmem:[%s1574_s11] sm:$0xff] }
  0x2a   :  { %208 = vmatmul.bf16.vlgmr.msra.gmra.mxu0 %v835_v32  ;;  %642 = vmatpush.bf16.msrb.mxu2 %v1190_v19 }
  0x2b   :  { %222 = vmatmul.bf16.vlgmr.msra.gmra.mxu1 %v839_v36  ;;  %489 = vmatpush.bf16.msrb.mxu0 %v1182_v51 }
  0x2c   :  { %551 = vmatpush.bf16.msrb.mxu1 %v1174_v39  ;;  %728 = vmatpush.bf16.msrb.mxu3 %v1197_v28 }
  0x2e   :  { %643 = vmatpush.bf16.msrb.mxu2 %v1189_v20 }
  0x2f   :  { %490 = vmatpush.bf16.msrb.mxu0 %v1181_v53 }
  0x30   :  { %552 = vmatpush.bf16.msrb.mxu1 %v1173_v40  ;;  %729 = vmatpush.bf16.msrb.mxu3 %v1196_v29 }
  0x32   :  { %644 = vmatpush.bf16.msrb.mxu2 %v1188_v21 }
  0x33   :  { %491 = vmatpush.bf16.msrb.mxu0 %v1180_v55 }
  0x34   :  { %553 = vmatpush.bf16.msrb.mxu1 %v1172_v41  ;;  %730 = vmatpush.bf16.msrb.mxu3 %v1195_v30 }
  0x36   :  { %645 = vmatpush.bf16.msrb.mxu2 %v1187_v22 }
  0x37   :  { %492 = vmatpush.bf16.msrb.mxu0 %v1179_v57 }
  0x38   :  { %554 = vmatpush.bf16.msrb.mxu1 %v1171_v42 }
  0x3a   :  { %646 = vmatpush.bf16.msrb.mxu2 %v1186_v23 }
  0x3b   :  { %493 = vmatpush.bf16.msrb.mxu0 %v1178_v7  ;;  %v1213_v7 = vld [vmem:[%s1578_s16] ss:$0 sm:$0xff] }
  0x3c   :  { %555 = vmatpush.bf16.msrb.mxu1 %v1170_v52  ;;  %v1211_v52 = vld [vmem:[%s1573_s12] ss:$0 sm:$0xff] }
  0x3e   :  { %647 = vmatpush.bf16.msrb.mxu2 %v1185_v24 }
  0x3f   :  { %494 = vmatpush.bf16.msrb.mxu0 %v1177_v8 }
  0x40   :  { %556 = vmatpush.bf16.msrb.mxu1 %v1169_v54 }
  0x42   :  { %648 = vmatpush.bf16.msrb.mxu2 %v1184_v25 }
  0x43   :  { %495 = vmatpush.bf16.msrb.mxu0 %v1176_v9 }
  0x44   :  { %557 = vmatpush.bf16.msrb.mxu1 %v1168_v56 }
  0x46   :  { %649 = vmatpush.bf16.msrb.mxu2 %v1183_v26 }
  0x47   :  { %496 = vmatpush.bf16.msrb.mxu0 %v1175_v10 }
  0x48   :  { %558 = vmatpush.bf16.msrb.mxu1 %v1167_v58 }
  0xa7   :  { %v209_v60 = vpop.f32.mrf.mxu0 }
  0xa8   :  { %v223_v61 = vpop.f32.mrf.mxu1  ;;  %v210_v62 = vadd.f32 %v1208_v59, %v209_v60  ;;  %v1201_v60 = vld [vmem:[%s1577_s15 + $0x10] sm:$0xff] }
  0xaa   :  { %v224_v63 = vadd.f32 %v223_v61, %v210_v62  ;;  %v1200_v61 = vld [vmem:[%s1577_s15 + $0x8] sm:$0xff]  ;;  %v1199_v62 = vld [vmem:[%s1577_s15] sm:$0xff] }
  0xac   :  { %v315_v43 = vpop.f32.mrf.mxu2  ;;  %v228_v3 = vmax.f32 %v224_v63, 0.0 }
  0xad   :  { %v316_v45 = vadd.f32 %v1207_v44, %v315_v43  ;;  %v1194_v43 = vld [vmem:[%s1575_s13 + $0x18] sm:$0xff] }
  0xae   :  { %731 = vmatpush.bf16.msrb.mxu3 %v1194_v43 }
  0xaf   :  { %v320_v48 = vmax.f32 %v316_v45, 0.0  ;;  %v211_v0 = vpop.f32.mrf.mxu0  ;;  %v1192_v45 = vld [vmem:[%s1575_s13 + $0x8] sm:$0xff] }
  0xb0   :  { %v212_v1 = vadd.f32 %v1208_v59, %v211_v0  ;;  %v225_v2 = vpop.f32.mrf.mxu1  ;;  %v1202_v59 = vld [vmem:[%s1577_s15 + $0x18] sm:$0xff]  ;;  %v1212_v0 = vld [vmem:[%s1576_s14] ss:$0 sm:$0xff] }
  0xb2   :  { %v226_v4 = vadd.f32 %v225_v2, %v212_v1 }
  0xb4   :  { %v317_v46 = vpop.f32.mrf.mxu2  ;;  %v229_v5 = vmax.f32 %v226_v4, 0.0 }
  0xb5   :  { %v318_v47 = vadd.f32 %v1207_v44, %v317_v46  ;;  %v1193_v44 = vld [vmem:[%s1575_s13 + $0x10] sm:$0xff]  ;;  %v1191_v46 = vld [vmem:[%s1575_s13] sm:$0xff] }
  0xb6   :  { %v407_v6 = vpack.c.bf16 %v229_v5, %v228_v3  ;;  %732 = vmatpush.bf16.msrb.mxu3 %v1193_v44 }
  0xb7   :  { %v321_v49 = vmax.f32 %v318_v47, 0.0  ;;  %v1206_v47 = vld [vmem:[%s1577_s15 + $0x38] sm:$0xff] }
  0xb8   :  { %559 = vmatmul.bf16.vlgmr.msrb.gmra.mxu1 %v407_v6  ;;  %812 = vmatpush.bf16.msra.mxu0 %v1206_v47 }
  0xb9   :  { %v322_v50 = vpack.c.bf16 %v321_v49, %v320_v48  ;;  %v1205_v48 = vld [vmem:[%s1577_s15 + $0x30] sm:$0xff]  ;;  %v1204_v49 = vld [vmem:[%s1577_s15 + $0x28] sm:$0xff] }
  0xba   :  { %733 = vmatpush.bf16.msrb.mxu3 %v1192_v45 }
  0xbb   :  { %399 = vmatmul.bf16.vlgmr.msra.gmra.mxu3 %v322_v50  ;;  %v1203_v50 = vld [vmem:[%s1577_s15 + $0x20] sm:$0xff] }
  0xbc   :  { %813 = vmatpush.bf16.msra.mxu0 %v1205_v48 }
  0xbe   :  { %734 = vmatpush.bf16.msrb.mxu3 %v1191_v46 }
  0xc0   :  { %814 = vmatpush.bf16.msra.mxu0 %v1204_v49 }
  0xc4   :  { %815 = vmatpush.bf16.msra.mxu0 %v1203_v50 }
  0xc8   :  { %816 = vmatpush.bf16.msra.mxu0 %v1202_v59 }
  0xcc   :  { %817 = vmatpush.bf16.msra.mxu0 %v1201_v60 }
  0xd0   :  { %818 = vmatpush.bf16.msra.mxu0 %v1200_v61 }
  0xd4   :  { %819 = vmatpush.bf16.msra.mxu0 %v1199_v62 }
 0x135   :  { %v560_v31 = vpop.f32.mrf.mxu1 }
 0x13d   :  { %v562_v35 = vpop.f32.mrf.mxu1 }
 0x13e   :  { %v400_v11 = vpop.f32.mrf.mxu3 }
 0x13f   :  { %v401_v13 = vadd.f32 %v1209_v12, %v400_v11 }
 0x141   :  { %v405_v16 = vmax.f32 %v401_v13, 0.0 }
 0x146   :  { %v402_v14 = vpop.f32.mrf.mxu3 }
 0x147   :  { %v403_v15 = vadd.f32 %v1209_v12, %v402_v14 }
 0x149   :  { %v406_v17 = vmax.f32 %v403_v15, 0.0 }
 0x14b   :  { %v424_v18 = vpack.c.bf16 %v406_v17, %v405_v16 }
 0x14d   :  { %497 = vmatmul.bf16.vlgmr.msrb.gmra.mxu0 %v424_v18 }
 0x1ca   :  { %v498_v32 = vpop.f32.mrf.mxu0 }
 0x1cb   :  { %v561_v33 = vadd.f32 %v560_v31, %v498_v32 }
 0x1cd   :  { %v569_v37 = vadd.f32 %v1210_v34, %v561_v33 }
 0x1cf   :  { %v571_v40 = vmax.f32 %v569_v37, 0.0 }
 0x1d2   :  { %v500_v36 = vpop.f32.mrf.mxu0 }
 0x1d3   :  { %v563_v38 = vadd.f32 %v562_v35, %v500_v36 }
 0x1d5   :  { %v570_v39 = vadd.f32 %v1210_v34, %v563_v38 }
 0x1d7   :  { %v572_v41 = vmax.f32 %v570_v39, 0.0 }
 0x1d9   :  { %v573_v42 = vpack.c.bf16 %v572_v41, %v571_v40 }
 0x1db   :  { %650 = vmatmul.bf16.vlgmr.msrb.gmra.mxu2 %v573_v42 }
 0x25e   :  { %v651_v51 = vpop.f32.mrf.mxu2 }
 0x25f   :  { %v652_v53 = vadd.f32 %v1211_v52, %v651_v51 }
 0x261   :  { %v656_v56 = vmax.f32 %v652_v53, 0.0 }
 0x266   :  { %v653_v54 = vpop.f32.mrf.mxu2 }
 0x267   :  { %v654_v55 = vadd.f32 %v1211_v52, %v653_v54 }
 0x269   :  { %v657_v57 = vmax.f32 %v654_v55, 0.0 }
 0x26b   :  { %v658_v58 = vpack.c.bf16 %v657_v57, %v656_v56 }
 0x26d   :  { %735 = vmatmul.bf16.vlgmr.msrb.gmra.mxu3 %v658_v58 }
 0x2f0   :  { %v736_v63 = vpop.f32.mrf.mxu3 }
 0x2f1   :  { %v737_v1 = vadd.f32 %v1212_v0, %v736_v63 }
 0x2f3   :  { %v741_v4 = vmax.f32 %v737_v1, 0.0 }
 0x2f8   :  { %v738_v2 = vpop.f32.mrf.mxu3 }
 0x2f9   :  { %v739_v3 = vadd.f32 %v1212_v0, %v738_v2 }
 0x2fb   :  { %v742_v5 = vmax.f32 %v739_v3, 0.0 }
 0x2fd   :  { %v743_v6 = vpack.c.bf16 %v742_v5, %v741_v4 }
 0x2ff   :  { %820 = vmatmul.bf16.vlgmr.msra.gmra.mxu0 %v743_v6 }
 0x37c   :  { %v821_v8 = vpop.f32.mrf.mxu0 }
 0x37d   :  { %v822_v9 = vadd.f32 %v1213_v7, %v821_v8 }
 0x37f   :  { %826 = vst [vmem:[%s1579_s17] sm:$0xff] %v822_v9 }
 0x384   :  { %v823_v10 = vpop.f32.mrf.mxu0 }
 0x385   :  { %v824_v11 = vadd.f32 %v1213_v7, %v823_v10 }
 0x387   :  { %827 = vst [vmem:[%s1579_s17 + $0x8] sm:$0xff] %v824_v11 }

</bundles_post_ra>
